<compile_context>
chip_gen: v7x
topology: tpu7x:2x2x1
jax: 0.10.0
libtpu: 0.0.40
codegen_flags: <defaults>
</compile_context>

<pallas_src>
import jax
import jax.numpy as jnp
from jax.experimental import pallas as pl
from jax.experimental.pallas import tpu as pltpu

_VMEM_LIMIT = 32 * 1024 * 1024  # explicit scoped-VMEM cap (fits v5e/v6e/v7x)


# ----------------------------- kernels --------------------------------------
def _conv_bn_relu_pool_kernel(p_ref, w_ref, s_ref, b_ref, o_ref):
    """Fused conv-as-matmul + BatchNorm affine + ReLU + 2x2 maxpool.

    p_ref : [4, TM, K] bf16  im2col patches, one slab per pool phase
    w_ref : [K, C]     bf16  conv weight (C = 32)
    s_ref : [1, C]     f32   folded BN scale  (gamma / sqrt(var + eps))
    b_ref : [1, C]     f32   folded BN bias   (absorbs conv bias)
    o_ref : [TM, C]    bf16  pooled activations
    """
    ph, tm, k = p_ref.shape
    x = p_ref[...].reshape(ph * tm, k)              # layout-preserving (tm % 16 == 0)
    z = jnp.dot(x, w_ref[...], preferred_element_type=jnp.float32)
    z = z * s_ref[...] + b_ref[...]                 # BN affine per pre-pool element
    z = z.reshape(ph, tm, z.shape[-1])
    m = jnp.maximum(jnp.maximum(z[0], z[1]), jnp.maximum(z[2], z[3]))  # 2x2 pool
    o_ref[...] = jnp.maximum(m, 0.0).astype(o_ref.dtype)   # ReLU (commutes with max)


def _fc_softmax_kernel(x_ref, w1_ref, b1_ref, w2_ref, b2_ref, o_ref):
    """Fused fc1 + ReLU + fc2 + bias + softmax (hidden never leaves VMEM).

    x_ref : [M, 512]  bf16      w1_ref: [512, 256] bf16   b1_ref: [1, 256] f32
    w2_ref: [256, 128] bf16 (cols >= 10 are zero)
    b2_ref: [1, 128]   f32  (cols >= 10 are -1e9 so softmax ignores them)
    o_ref : [M, 128]   f32
    """
    h = jnp.dot(x_ref[...], w1_ref[...], preferred_element_type=jnp.float32)
    h = jnp.maximum(h + b1_ref[...], 0.0).astype(jnp.bfloat16)
    logits = jnp.dot(h, w2_ref[...], preferred_element_type=jnp.float32) + b2_ref[...]
    mx = jnp.max(logits, axis=-1, keepdims=True)
    e = jnp.exp(logits - mx)
    o_ref[...] = e * pl.reciprocal(jnp.sum(e, axis=-1, keepdims=True), approx=False)


# ------------------------- pallas_call wrappers ------------------------------
def _pick_images_per_block(n_images, rows_per_img, target_rows=1024):
    """Images per grid step: keep blocks a few hundred KB (well under VMEM) and
    use >= 2 grid steps when possible so pipelining / dual-TC is exercised."""
    nb = max(1, min(n_images, max(1, target_rows // rows_per_img)))
    if n_images >= 2:
        nb = max(1, min(nb, n_images // 2))
    while n_images % nb:
        nb -= 1
    return nb


def conv_stage(patches, w, scale, bias, rows_per_img):
    """patches: [4, M, K] bf16 (M = N * rows_per_img)  ->  pooled [M, 32] bf16."""
    _, m, k = patches.shape
    c = w.shape[1]
    n_img = m // rows_per_img
    nb = _pick_images_per_block(n_img, rows_per_img)
    tm = nb * rows_per_img                          # multiple of 16 (144 / 16 rows)
    grid = (n_img // nb,)
    return pl.pallas_call(
        _conv_bn_relu_pool_kernel,
        grid=grid,
        in_specs=[
            pl.BlockSpec((4, tm, k), lambda b: (0, b, 0)),
            pl.BlockSpec((k, c), lambda b: (0, 0)),
            pl.BlockSpec((1, c), lambda b: (0, 0)),
            pl.BlockSpec((1, c), lambda b: (0, 0)),
        ],
        out_specs=pl.BlockSpec((tm, c), lambda b: (b, 0)),
        out_shape=jax.ShapeDtypeStruct((m, c), jnp.bfloat16),
        compiler_params=pltpu.CompilerParams(
            dimension_semantics=("parallel",),
            vmem_limit_bytes=_VMEM_LIMIT,
        ),
    )(patches, w, scale, bias)


def fc_head(flat, w1, b1, w2p, b2p, out_dim):
    """softmax(relu(flat @ w1 + b1) @ w2p + b2p)[:, :out_dim] in one kernel."""
    m, k1 = flat.shape
    hdim = w1.shape[1]
    npad = w2p.shape[1]
    out = pl.pallas_call(
        _fc_softmax_kernel,
        grid=(1,),
        in_specs=[
            pl.BlockSpec((m, k1), lambda i: (0, 0)),
            pl.BlockSpec((k1, hdim), lambda i: (0, 0)),
            pl.BlockSpec((1, hdim), lambda i: (0, 0)),
            pl.BlockSpec((hdim, npad), lambda i: (0, 0)),
            pl.BlockSpec((1, npad), lambda i: (0, 0)),
        ],
        out_specs=pl.BlockSpec((m, npad), lambda i: (0, 0)),
        out_shape=jax.ShapeDtypeStruct((m, npad), jnp.float32),
        compiler_params=pltpu.CompilerParams(
            dimension_semantics=("arbitrary",),
            vmem_limit_bytes=_VMEM_LIMIT,
        ),
    )(flat, w1, b1, w2p, b2p)
    return out[:, :out_dim]


# ------------------------------ glue -----------------------------------------
def _phase_pool_patches(x, kh, kw):
    """im2col for 'valid' kh x kw conv followed by 2x2/2 max-pool, split by the
    four pool phases.  x: [N, H, W, C] -> [4, N*PH*PW, C*kh*kw].

    Row order (n, i, j) over pooled positions; feature order (c, ki, kj) with c
    slowest, matching torch conv weight .reshape(C_out, C_in*kh*kw)."""
    n, hgt, wid, c = x.shape
    oh, ow = hgt - kh + 1, wid - kw + 1
    ph, pw = oh // 2, ow // 2
    phases = []
    for di in range(2):
        for dj in range(2):
            taps = []
            for ki in range(kh):
                for kj in range(kw):
                    taps.append(x[:, di + ki:di + ki + 2 * ph:2,
                                     dj + kj:dj + kj + 2 * pw:2, :])  # [N,PH,PW,C]
            t = jnp.stack(taps, axis=-1)                              # [N,PH,PW,C,kh*kw]
            phases.append(t.reshape(n * ph * pw, c * kh * kw))
    return jnp.stack(phases, axis=0), (ph, pw)
# TODO(synk): conv2's im2col is still built by XLA glue; doing it from VMEM
#             inside the kernel needs strided/relayout value ops kept out here
#             for lowering robustness.


# ----------------------------- parameters ------------------------------------
def init_params(key):
    eps = 1e-4
    nf, full = 32, 256
    ks = jax.random.split(key, 16)
    p = {}
    p["conv1_w"] = 0.1 * jax.random.normal(ks[0], (nf, 1, 5, 5), jnp.float32)
    p["conv1_b"] = 0.1 * jax.random.normal(ks[1], (nf,), jnp.float32)
    p["bn1_g"] = 1.0 + 0.1 * jax.random.normal(ks[2], (nf,), jnp.float32)
    p["bn1_b"] = 0.1 * jax.random.normal(ks[3], (nf,), jnp.float32)
    p["bn1_m"] = 0.1 * jax.random.normal(ks[4], (nf,), jnp.float32)
    p["bn1_v"] = jax.random.uniform(ks[5], (nf,), jnp.float32, 0.5, 1.5)

    p["conv2_w"] = 0.05 * jax.random.normal(ks[6], (nf, nf, 5, 5), jnp.float32)
    p["conv2_b"] = 0.1 * jax.random.normal(ks[7], (nf,), jnp.float32)
    p["bn2_g"] = 1.0 + 0.1 * jax.random.normal(ks[8], (nf,), jnp.float32)
    p["bn2_b"] = 0.1 * jax.random.normal(ks[9], (nf,), jnp.float32)
    p["bn2_m"] = 0.1 * jax.random.normal(ks[10], (nf,), jnp.float32)
    p["bn2_v"] = jax.random.uniform(ks[11], (nf,), jnp.float32, 0.5, 1.5)

    p["fc1_w"] = 0.05 * jax.random.normal(ks[12], (full, 512), jnp.float32)
    p["fc1_b"] = 0.1 * jax.random.normal(ks[13], (full,), jnp.float32)
    p["fc2_w"] = 0.05 * jax.random.normal(ks[14], (10, full), jnp.float32)
    p["fc2_b"] = 0.1 * jax.random.normal(ks[15], (10,), jnp.float32)
    p["eps"] = eps
    return p


def prepare_params(p):
    """One-time (outside jit) prep: BN folding, weight transposes, the fc1
    column permutation that absorbs PyTorch's NCHW .view(-1, 512) flatten,
    fc2 lane padding to 128, and bf16 casts of all MXU operands."""
    eps = p["eps"]

    def fold(conv_b, g, b, m, v):
        s = g / jnp.sqrt(v + eps)
        return s, b + s * (conv_b - m)

    s1, b1 = fold(p["conv1_b"], p["bn1_g"], p["bn1_b"], p["bn1_m"], p["bn1_v"])
    s2, b2 = fold(p["conv2_b"], p["bn2_g"], p["bn2_b"], p["bn2_m"], p["bn2_v"])

    prep = {
        "w1": p["conv1_w"].reshape(32, 25).T.astype(jnp.bfloat16),    # [25, 32]
        "s1": s1.reshape(1, 32).astype(jnp.float32),
        "b1": b1.reshape(1, 32).astype(jnp.float32),
        "w2": p["conv2_w"].reshape(32, 800).T.astype(jnp.bfloat16),   # [800, 32]
        "s2": s2.reshape(1, 32).astype(jnp.float32),
        "b2": b2.reshape(1, 32).astype(jnp.float32),
    }

    # fc1: permute columns so it directly consumes our NHWC-flattened
    # [N, (h*128 + w*32 + c)] vector instead of torch's NCHW (c*16 + h*4 + w).
    f = jnp.arange(512)
    perm = (f % 32) * 16 + (f // 128) * 4 + (f // 32) % 4
    prep["fw1"] = p["fc1_w"][:, perm].T.astype(jnp.bfloat16)          # [512, 256]
    prep["fb1"] = p["fc1_b"].reshape(1, 256).astype(jnp.float32)

    # fc2: transpose and pad the 10 output lanes to 128 once; padded logits get
    # a -1e9 bias so the in-kernel softmax zeroes them.
    fw2 = jnp.zeros((256, 128), jnp.float32).at[:, :10].set(p["fc2_w"].T)
    fb2 = jnp.full((1, 128), -1e9, jnp.float32).at[0, :10].set(p["fc2_b"])
    prep["fw2"] = fw2.astype(jnp.bfloat16)
    prep["fb2"] = fb2
    return prep


# ------------------------------ forward --------------------------------------
@jax.jit
def net_forward(x_nchw, prep):
    n = x_nchw.shape[0]
    x = jnp.transpose(x_nchw, (0, 2, 3, 1)).astype(jnp.bfloat16)      # NHWC bf16

    # conv1(1->32, 5x5) + BN + ReLU + maxpool2   ->  [N*12*12, 32] (NHWC rows)
    p1, (h1, w1) = _phase_pool_patches(x, 5, 5)                       # [4, N*144, 25]
    y1 = conv_stage(p1, prep["w1"], prep["s1"], prep["b1"], h1 * w1)

    # conv2(32->32, 5x5) + BN + ReLU + maxpool2  ->  [N*4*4, 32]
    # (Dropout2d p=0.5 is identity in eval mode)
    y1 = y1.reshape(n, h1, w1, 32)
    p2, (h2, w2) = _phase_pool_patches(y1, 5, 5)                      # [4, N*16, 800]
    y2 = conv_stage(p2, prep["w2"], prep["s2"], prep["b2"], h2 * w2)

    # flatten; the NCHW .view(-1, 512) ordering is pre-folded into fc1's weights
    flat = y2.reshape(n, h2 * w2 * 32)                                # [N, 512] bf16

    # fc1 + ReLU (+ Dropout p=0.0 identity) + fc2 + Softmax, fused
    return fc_head(flat, prep["fw1"], prep["fb1"], prep["fw2"], prep["fb2"], 10)


# ----------------------- pure-JAX reference (f32) ----------------------------
def _reference_forward(x_nchw, p):
    eps = p["eps"]

    def conv_bn_relu_pool(x, w, b, g, beta, m, v):
        y = jax.lax.conv_general_dilated(
            x, w, (1, 1), "VALID", dimension_numbers=("NCHW", "OIHW", "NCHW"))
        y = y + b.reshape(1, -1, 1, 1)
        y = (y - m.reshape(1, -1, 1, 1)) / jnp.sqrt(v.reshape(1, -1, 1, 1) + eps)
        y = y * g.reshape(1, -1, 1, 1) + beta.reshape(1, -1, 1, 1)
        y = jnp.maximum(y, 0.0)
        n, c, hh, ww = y.shape
        return y.reshape(n, c, hh // 2, 2, ww // 2, 2).max(axis=(3, 5))

    x = x_nchw.astype(jnp.float32)
    y = conv_bn_relu_pool(x, p["conv1_w"], p["conv1_b"],
                          p["bn1_g"], p["bn1_b"], p["bn1_m"], p["bn1_v"])
    y = conv_bn_relu_pool(y, p["conv2_w"], p["conv2_b"],
                          p["bn2_g"], p["bn2_b"], p["bn2_m"], p["bn2_v"])
    flat = y.reshape(y.shape[0], -1)                                  # NCHW flatten
    h = jnp.maximum(flat @ p["fc1_w"].T + p["fc1_b"], 0.0)
    logits = h @ p["fc2_w"].T + p["fc2_b"]
    return jax.nn.softmax(logits, axis=-1)


# TODO(synk): training-mode BatchNorm (batch statistics) and active Dropout2d
#             are not implemented; this reproduces eval-mode forward semantics.

if __name__ == "__main__":
    key = jax.random.PRNGKey(0)
    k_param, k_input = jax.random.split(key)
    params = init_params(k_param)
    prep = prepare_params(params)                    # one-time prep, outside jit
    x = jax.random.normal(k_input, (2, 1, 28, 28), jnp.float32)       # NCHW input

    out = net_forward(x, prep)
    out = jax.block_until_ready(out)

    assert out.shape == (2, 10), out.shape
    row_sums = jnp.sum(out, axis=-1)
    assert bool(jnp.all(jnp.abs(row_sums - 1.0) < 1e-3)), row_sums
    assert bool(jnp.all(out >= 0.0))

    # correctness vs a pure-JAX f32 reference (loose tol: kernel uses bf16 MXU)
    ref = jax.block_until_ready(_reference_forward(x, params))
    assert bool(jnp.all(jnp.abs(out - ref) < 5e-2)), jnp.max(jnp.abs(out - ref))

    print("KERNEL_OK")
</pallas_src>

<mosaic_0001>
module attributes {stable_mosaic.version = 11 : i64} {
  func.func @_conv_bn_relu_pool_kernel(%arg0: i32, %arg1: memref<4x144x25xbf16, #tpu.memory_space<vmem>>, %arg2: memref<25x32xbf16, #tpu.memory_space<vmem>>, %arg3: memref<1x32xf32, #tpu.memory_space<vmem>>, %arg4: memref<1x32xf32, #tpu.memory_space<vmem>>, %arg5: memref<144x32xbf16, #tpu.memory_space<vmem>>) attributes {dimension_semantics = [#tpu.dimension_semantics<parallel>], iteration_bounds = array<i64: 2>, scalar_prefetch = 0 : i64, scratch_operands = 0 : i64, tpu.core_type = #tpu.core_type<tc>, window_params = [{transform_indices = @transform_0, window_bounds = array<i64: 4, 144, 25>}, {pipeline_mode = #tpu.pipeline_mode<synchronous>, transform_indices = @transform_1, window_bounds = array<i64: 25, 32>}, {pipeline_mode = #tpu.pipeline_mode<synchronous>, transform_indices = @transform_2, window_bounds = array<i64: 1, 32>}, {pipeline_mode = #tpu.pipeline_mode<synchronous>, transform_indices = @transform_3, window_bounds = array<i64: 1, 32>}, {transform_indices = @transform_4, window_bounds = array<i64: 144, 32>}]} {
    %c0 = arith.constant 0 : index
    %c0_0 = arith.constant 0 : index
    %c0_1 = arith.constant 0 : index
    %0 = vector.load %arg1[%c0, %c0_0, %c0_1] : memref<4x144x25xbf16, #tpu.memory_space<vmem>>, vector<4x144x25xbf16>
    %1 = vector.shape_cast %0 : vector<4x144x25xbf16> to vector<576x25xbf16>
    %c0_2 = arith.constant 0 : index
    %c0_3 = arith.constant 0 : index
    %2 = vector.load %arg2[%c0_2, %c0_3] : memref<25x32xbf16, #tpu.memory_space<vmem>>, vector<25x32xbf16>
    %cst = arith.constant dense<0.000000e+00> : vector<576x32xf32>
    %3 = tpu.matmul %1, %2, %cst {dimension_numbers = #tpu.dot_dimension_numbers<[1], [0], [0], [1], [0, 0, 1, 1], [], []>} : vector<576x25xbf16>, vector<25x32xbf16>, vector<576x32xf32> -> vector<576x32xf32>
    %c0_4 = arith.constant 0 : index
    %c0_5 = arith.constant 0 : index
    %4 = vector.load %arg3[%c0_4, %c0_5] : memref<1x32xf32, #tpu.memory_space<vmem>>, vector<1x32xf32>
    %5 = vector.broadcast %4 : vector<1x32xf32> to vector<576x32xf32>
    %6 = arith.mulf %3, %5 : vector<576x32xf32>
    %c0_6 = arith.constant 0 : index
    %c0_7 = arith.constant 0 : index
    %7 = vector.load %arg4[%c0_6, %c0_7] : memref<1x32xf32, #tpu.memory_space<vmem>>, vector<1x32xf32>
    %8 = vector.broadcast %7 : vector<1x32xf32> to vector<576x32xf32>
    %9 = arith.addf %6, %8 : vector<576x32xf32>
    %10 = vector.shape_cast %9 : vector<576x32xf32> to vector<4x144x32xf32>
    %11 = vector.extract_strided_slice %10 {offsets = [0, 0, 0], sizes = [1, 144, 32], strides = [1, 1, 1]} : vector<4x144x32xf32> to vector<1x144x32xf32>
    %12 = vector.shape_cast %11 : vector<1x144x32xf32> to vector<144x32xf32>
    %13 = vector.extract_strided_slice %10 {offsets = [1, 0, 0], sizes = [1, 144, 32], strides = [1, 1, 1]} : vector<4x144x32xf32> to vector<1x144x32xf32>
    %14 = vector.shape_cast %13 : vector<1x144x32xf32> to vector<144x32xf32>
    %15 = arith.maximumf %12, %14 : vector<144x32xf32>
    %16 = vector.extract_strided_slice %10 {offsets = [2, 0, 0], sizes = [1, 144, 32], strides = [1, 1, 1]} : vector<4x144x32xf32> to vector<1x144x32xf32>
    %17 = vector.shape_cast %16 : vector<1x144x32xf32> to vector<144x32xf32>
    %18 = vector.extract_strided_slice %10 {offsets = [3, 0, 0], sizes = [1, 144, 32], strides = [1, 1, 1]} : vector<4x144x32xf32> to vector<1x144x32xf32>
    %19 = vector.shape_cast %18 : vector<1x144x32xf32> to vector<144x32xf32>
    %20 = arith.maximumf %17, %19 : vector<144x32xf32>
    %21 = arith.maximumf %15, %20 : vector<144x32xf32>
    %cst_8 = arith.constant 0.000000e+00 : f32
    %22 = vector.broadcast %cst_8 : f32 to vector<144x32xf32>
    %23 = arith.maximumf %21, %22 : vector<144x32xf32>
    %24 = arith.truncf %23 : vector<144x32xf32> to vector<144x32xbf16>
    %c0_9 = arith.constant 0 : index
    %c0_10 = arith.constant 0 : index
    %25 = vector.load %arg5[%c0_9, %c0_10] : memref<144x32xbf16, #tpu.memory_space<vmem>>, vector<144x32xbf16>
    tpu.vector_store %arg5[%c0_9, %c0_10], %24 {strides = array<i32>} : memref<144x32xbf16, #tpu.memory_space<vmem>>, vector<144x32xbf16>,
    return
  }
  func.func @transform_0(%arg0: i32) -> (i32, i32, i32) {
    %c0_i32 = arith.constant 0 : i32
    %c0_i32_0 = arith.constant 0 : i32
    %c0_i32_1 = arith.constant 0 : i32
    return %c0_i32, %arg0, %c0_i32_0 : i32, i32, i32
  }
  func.func @transform_1(%arg0: i32) -> (i32, i32) {
    %c0_i32 = arith.constant 0 : i32
    %c0_i32_0 = arith.constant 0 : i32
    %c0_i32_1 = arith.constant 0 : i32
    return %c0_i32, %c0_i32_0 : i32, i32
  }
  func.func @transform_2(%arg0: i32) -> (i32, i32) {
    %c0_i32 = arith.constant 0 : i32
    %c0_i32_0 = arith.constant 0 : i32
    %c0_i32_1 = arith.constant 0 : i32
    return %c0_i32, %c0_i32_0 : i32, i32
  }
  func.func @transform_3(%arg0: i32) -> (i32, i32) {
    %c0_i32 = arith.constant 0 : i32
    %c0_i32_0 = arith.constant 0 : i32
    %c0_i32_1 = arith.constant 0 : i32
    return %c0_i32, %c0_i32_0 : i32, i32
  }
  func.func @transform_4(%arg0: i32) -> (i32, i32) {
    %c0_i32 = arith.constant 0 : i32
    %c0_i32_0 = arith.constant 0 : i32
    return %arg0, %c0_i32 : i32, i32
  }
}

module attributes {stable_mosaic.version = 11 : i64} {
  func.func @_conv_bn_relu_pool_kernel(%arg0: i32, %arg1: memref<4x16x800xbf16, #tpu.memory_space<vmem>>, %arg2: memref<800x32xbf16, #tpu.memory_space<vmem>>, %arg3: memref<1x32xf32, #tpu.memory_space<vmem>>, %arg4: memref<1x32xf32, #tpu.memory_space<vmem>>, %arg5: memref<16x32xbf16, #tpu.memory_space<vmem>>) attributes {dimension_semantics = [#tpu.dimension_semantics<parallel>], iteration_bounds = array<i64: 2>, scalar_prefetch = 0 : i64, scratch_operands = 0 : i64, tpu.core_type = #tpu.core_type<tc>, window_params = [{transform_indices = @transform_0, window_bounds = array<i64: 4, 16, 800>}, {pipeline_mode = #tpu.pipeline_mode<synchronous>, transform_indices = @transform_1, window_bounds = array<i64: 800, 32>}, {pipeline_mode = #tpu.pipeline_mode<synchronous>, transform_indices = @transform_2, window_bounds = array<i64: 1, 32>}, {pipeline_mode = #tpu.pipeline_mode<synchronous>, transform_indices = @transform_3, window_bounds = array<i64: 1, 32>}, {transform_indices = @transform_4, window_bounds = array<i64: 16, 32>}]} {
    %c0 = arith.constant 0 : index
    %c0_0 = arith.constant 0 : index
    %c0_1 = arith.constant 0 : index
    %0 = vector.load %arg1[%c0, %c0_0, %c0_1] : memref<4x16x800xbf16, #tpu.memory_space<vmem>>, vector<4x16x800xbf16>
    %1 = vector.shape_cast %0 : vector<4x16x800xbf16> to vector<64x800xbf16>
    %c0_2 = arith.constant 0 : index
    %c0_3 = arith.constant 0 : index
    %2 = vector.load %arg2[%c0_2, %c0_3] : memref<800x32xbf16, #tpu.memory_space<vmem>>, vector<800x32xbf16>
    %cst = arith.constant dense<0.000000e+00> : vector<64x32xf32>
    %3 = tpu.matmul %1, %2, %cst {dimension_numbers = #tpu.dot_dimension_numbers<[1], [0], [0], [1], [0, 0, 1, 1], [], []>} : vector<64x800xbf16>, vector<800x32xbf16>, vector<64x32xf32> -> vector<64x32xf32>
    %c0_4 = arith.constant 0 : index
    %c0_5 = arith.constant 0 : index
    %4 = vector.load %arg3[%c0_4, %c0_5] : memref<1x32xf32, #tpu.memory_space<vmem>>, vector<1x32xf32>
    %5 = vector.broadcast %4 : vector<1x32xf32> to vector<64x32xf32>
    %6 = arith.mulf %3, %5 : vector<64x32xf32>
    %c0_6 = arith.constant 0 : index
    %c0_7 = arith.constant 0 : index
    %7 = vector.load %arg4[%c0_6, %c0_7] : memref<1x32xf32, #tpu.memory_space<vmem>>, vector<1x32xf32>
    %8 = vector.broadcast %7 : vector<1x32xf32> to vector<64x32xf32>
    %9 = arith.addf %6, %8 : vector<64x32xf32>
    %10 = vector.shape_cast %9 : vector<64x32xf32> to vector<4x16x32xf32>
    %11 = vector.extract_strided_slice %10 {offsets = [0, 0, 0], sizes = [1, 16, 32], strides = [1, 1, 1]} : vector<4x16x32xf32> to vector<1x16x32xf32>
    %12 = vector.shape_cast %11 : vector<1x16x32xf32> to vector<16x32xf32>
    %13 = vector.extract_strided_slice %10 {offsets = [1, 0, 0], sizes = [1, 16, 32], strides = [1, 1, 1]} : vector<4x16x32xf32> to vector<1x16x32xf32>
    %14 = vector.shape_cast %13 : vector<1x16x32xf32> to vector<16x32xf32>
    %15 = arith.maximumf %12, %14 : vector<16x32xf32>
    %16 = vector.extract_strided_slice %10 {offsets = [2, 0, 0], sizes = [1, 16, 32], strides = [1, 1, 1]} : vector<4x16x32xf32> to vector<1x16x32xf32>
    %17 = vector.shape_cast %16 : vector<1x16x32xf32> to vector<16x32xf32>
    %18 = vector.extract_strided_slice %10 {offsets = [3, 0, 0], sizes = [1, 16, 32], strides = [1, 1, 1]} : vector<4x16x32xf32> to vector<1x16x32xf32>
    %19 = vector.shape_cast %18 : vector<1x16x32xf32> to vector<16x32xf32>
    %20 = arith.maximumf %17, %19 : vector<16x32xf32>
    %21 = arith.maximumf %15, %20 : vector<16x32xf32>
    %cst_8 = arith.constant 0.000000e+00 : f32
    %22 = vector.broadcast %cst_8 : f32 to vector<16x32xf32>
    %23 = arith.maximumf %21, %22 : vector<16x32xf32>
    %24 = arith.truncf %23 : vector<16x32xf32> to vector<16x32xbf16>
    %c0_9 = arith.constant 0 : index
    %c0_10 = arith.constant 0 : index
    %25 = vector.load %arg5[%c0_9, %c0_10] : memref<16x32xbf16, #tpu.memory_space<vmem>>, vector<16x32xbf16>
    tpu.vector_store %arg5[%c0_9, %c0_10], %24 {strides = array<i32>} : memref<16x32xbf16, #tpu.memory_space<vmem>>, vector<16x32xbf16>,
    return
  }
  func.func @transform_0(%arg0: i32) -> (i32, i32, i32) {
    %c0_i32 = arith.constant 0 : i32
    %c0_i32_0 = arith.constant 0 : i32
    %c0_i32_1 = arith.constant 0 : i32
    return %c0_i32, %arg0, %c0_i32_0 : i32, i32, i32
  }
  func.func @transform_1(%arg0: i32) -> (i32, i32) {
    %c0_i32 = arith.constant 0 : i32
    %c0_i32_0 = arith.constant 0 : i32
    %c0_i32_1 = arith.constant 0 : i32
    return %c0_i32, %c0_i32_0 : i32, i32
  }
  func.func @transform_2(%arg0: i32) -> (i32, i32) {
    %c0_i32 = arith.constant 0 : i32
    %c0_i32_0 = arith.constant 0 : i32
    %c0_i32_1 = arith.constant 0 : i32
    return %c0_i32, %c0_i32_0 : i32, i32
  }
  func.func @transform_3(%arg0: i32) -> (i32, i32) {
    %c0_i32 = arith.constant 0 : i32
    %c0_i32_0 = arith.constant 0 : i32
    %c0_i32_1 = arith.constant 0 : i32
    return %c0_i32, %c0_i32_0 : i32, i32
  }
  func.func @transform_4(%arg0: i32) -> (i32, i32) {
    %c0_i32 = arith.constant 0 : i32
    %c0_i32_0 = arith.constant 0 : i32
    return %arg0, %c0_i32 : i32, i32
  }
}

module attributes {stable_mosaic.version = 11 : i64} {
  func.func @_fc_softmax_kernel(%arg0: i32, %arg1: memref<2x512xbf16, #tpu.memory_space<vmem>>, %arg2: memref<512x256xbf16, #tpu.memory_space<vmem>>, %arg3: memref<1x256xf32, #tpu.memory_space<vmem>>, %arg4: memref<256x128xbf16, #tpu.memory_space<vmem>>, %arg5: memref<1x128xf32, #tpu.memory_space<vmem>>, %arg6: memref<2x128xf32, #tpu.memory_space<vmem>>) attributes {dimension_semantics = [#tpu.dimension_semantics<arbitrary>], iteration_bounds = array<i64: 1>, scalar_prefetch = 0 : i64, scratch_operands = 0 : i64, tpu.core_type = #tpu.core_type<tc>, window_params = [{pipeline_mode = #tpu.pipeline_mode<synchronous>, transform_indices = @transform_0, window_bounds = array<i64: 2, 512>}, {pipeline_mode = #tpu.pipeline_mode<synchronous>, transform_indices = @transform_1, window_bounds = array<i64: 512, 256>}, {pipeline_mode = #tpu.pipeline_mode<synchronous>, transform_indices = @transform_2, window_bounds = array<i64: 1, 256>}, {pipeline_mode = #tpu.pipeline_mode<synchronous>, transform_indices = @transform_3, window_bounds = array<i64: 256, 128>}, {pipeline_mode = #tpu.pipeline_mode<synchronous>, transform_indices = @transform_4, window_bounds = array<i64: 1, 128>}, {pipeline_mode = #tpu.pipeline_mode<synchronous>, transform_indices = @transform_5, window_bounds = array<i64: 2, 128>}]} {
    %c0 = arith.constant 0 : index
    %c0_0 = arith.constant 0 : index
    %0 = vector.load %arg1[%c0, %c0_0] : memref<2x512xbf16, #tpu.memory_space<vmem>>, vector<2x512xbf16>
    %c0_1 = arith.constant 0 : index
    %c0_2 = arith.constant 0 : index
    %1 = vector.load %arg2[%c0_1, %c0_2] : memref<512x256xbf16, #tpu.memory_space<vmem>>, vector<512x256xbf16>
    %cst = arith.constant dense<0.000000e+00> : vector<2x256xf32>
    %2 = tpu.matmul %0, %1, %cst {dimension_numbers = #tpu.dot_dimension_numbers<[1], [0], [0], [1], [0, 0, 1, 1], [], []>} : vector<2x512xbf16>, vector<512x256xbf16>, vector<2x256xf32> -> vector<2x256xf32>
    %c0_3 = arith.constant 0 : index
    %c0_4 = arith.constant 0 : index
    %3 = vector.load %arg3[%c0_3, %c0_4] : memref<1x256xf32, #tpu.memory_space<vmem>>, vector<1x256xf32>
    %4 = vector.broadcast %3 : vector<1x256xf32> to vector<2x256xf32>
    %5 = arith.addf %2, %4 : vector<2x256xf32>
    %cst_5 = arith.constant 0.000000e+00 : f32
    %6 = vector.broadcast %cst_5 : f32 to vector<2x256xf32>
    %7 = arith.maximumf %5, %6 : vector<2x256xf32>
    %8 = arith.truncf %7 : vector<2x256xf32> to vector<2x256xbf16>
    %c0_6 = arith.constant 0 : index
    %c0_7 = arith.constant 0 : index
    %9 = vector.load %arg4[%c0_6, %c0_7] : memref<256x128xbf16, #tpu.memory_space<vmem>>, vector<256x128xbf16>
    %cst_8 = arith.constant dense<0.000000e+00> : vector<2x128xf32>
    %10 = tpu.matmul %8, %9, %cst_8 {dimension_numbers = #tpu.dot_dimension_numbers<[1], [0], [0], [1], [0, 0, 1, 1], [], []>} : vector<2x256xbf16>, vector<256x128xbf16>, vector<2x128xf32> -> vector<2x128xf32>
    %c0_9 = arith.constant 0 : index
    %c0_10 = arith.constant 0 : index
    %11 = vector.load %arg5[%c0_9, %c0_10] : memref<1x128xf32, #tpu.memory_space<vmem>>, vector<1x128xf32>
    %12 = vector.broadcast %11 : vector<1x128xf32> to vector<2x128xf32>
    %13 = arith.addf %10, %12 : vector<2x128xf32>
    %cst_11 = arith.constant dense<0xFF800000> : vector<2xf32>
    %14 = vector.multi_reduction <maximumf>, %13, %cst_11 [1] : vector<2x128xf32> to vector<2xf32>
    %15 = vector.shape_cast %14 : vector<2xf32> to vector<2x1xf32>
    %16 = vector.broadcast %15 : vector<2x1xf32> to vector<2x128xf32>
    %17 = arith.subf %13, %16 : vector<2x128xf32>
    %18 = math.exp %17 : vector<2x128xf32>
    %cst_12 = arith.constant dense<0.000000e+00> : vector<2xf32>
    %19 = vector.multi_reduction <add>, %18, %cst_12 [1] : vector<2x128xf32> to vector<2xf32>
    %20 = vector.shape_cast %19 : vector<2xf32> to vector<2x1xf32>
    %21 = tpu.reciprocal %20 : vector<2x1xf32> -> vector<2x1xf32>
    %22 = vector.broadcast %21 : vector<2x1xf32> to vector<2x128xf32>
    %23 = arith.mulf %18, %22 : vector<2x128xf32>
    %c0_13 = arith.constant 0 : index
    %c0_14 = arith.constant 0 : index
    %24 = vector.load %arg6[%c0_13, %c0_14] : memref<2x128xf32, #tpu.memory_space<vmem>>, vector<2x128xf32>
    tpu.vector_store %arg6[%c0_13, %c0_14], %23 {strides = array<i32>} : memref<2x128xf32, #tpu.memory_space<vmem>>, vector<2x128xf32>,
    return
  }
  func.func @transform_0(%arg0: i32) -> (i32, i32) {
    %c0_i32 = arith.constant 0 : i32
    %c0_i32_0 = arith.constant 0 : i32
    %c0_i32_1 = arith.constant 0 : i32
    return %c0_i32, %c0_i32_0 : i32, i32
  }
  func.func @transform_1(%arg0: i32) -> (i32, i32) {
    %c0_i32 = arith.constant 0 : i32
    %c0_i32_0 = arith.constant 0 : i32
    %c0_i32_1 = arith.constant 0 : i32
    return %c0_i32, %c0_i32_0 : i32, i32
  }
  func.func @transform_2(%arg0: i32) -> (i32, i32) {
    %c0_i32 = arith.constant 0 : i32
    %c0_i32_0 = arith.constant 0 : i32
    %c0_i32_1 = arith.constant 0 : i32
    return %c0_i32, %c0_i32_0 : i32, i32
  }
  func.func @transform_3(%arg0: i32) -> (i32, i32) {
    %c0_i32 = arith.constant 0 : i32
    %c0_i32_0 = arith.constant 0 : i32
    %c0_i32_1 = arith.constant 0 : i32
    return %c0_i32, %c0_i32_0 : i32, i32
  }
  func.func @transform_4(%arg0: i32) -> (i32, i32) {
    %c0_i32 = arith.constant 0 : i32
    %c0_i32_0 = arith.constant 0 : i32
    %c0_i32_1 = arith.constant 0 : i32
    return %c0_i32, %c0_i32_0 : i32, i32
  }
  func.func @transform_5(%arg0: i32) -> (i32, i32) {
    %c0_i32 = arith.constant 0 : i32
    %c0_i32_0 = arith.constant 0 : i32
    %c0_i32_1 = arith.constant 0 : i32
    return %c0_i32, %c0_i32_0 : i32, i32
  }
}

</mosaic_0001>

<bundles_post_ra>
// kernel: net_forward.3
= control target key start
LH: loop header
LB: loop body
LE: loop exit
PB: predicated region body
PF: predicated region fallthrough
CT: control target
= control target key end

     0   :  { %s1969_s15 = smov 0   ;;  %s1971_s16 = smov 0   ;;  %s2486_s0 = inlined_call_operand.vmem [shape: bf16[4,288,25], index: 0, kind: input, shape index: {}]   ;;  %s2487_s1 = inlined_call_operand.vmem [shape: bf16[25,32], index: 1, kind: input, shape index: {}]   ;;  %s2488_s2 = inlined_call_operand.vmem [shape: f32[1,32], index: 2, kind: input, shape index: {}]   ;;  %s2489_s3 = inlined_call_operand.vmem [shape: f32[1,32], index: 3, kind: input, shape index: {}]   ;;  %s2490_s4 = inlined_call_operand.vmem [shape: bf16[288,32], index: 4, kind: output, shape index: {}]  }
   0x1   :  { %s1973_s17 = smov 0  }
   0x2 LB: > { %s1614_s18 = sadd.s32 4294967295, %s1941_s17   ;;  %s1986_s19 = sadd.s32 1, %s1941_s17   ;;  %s1941_s17 = sphi %s1973_s17, %s2493_s17   ;;  %s1937_s16 = sphi %s1971_s16, %s2492_s16   ;;  %s1933_s15 = sphi %s1969_s15, %s2491_s15  }
   0x3   : > { %s18_s20 = ssub.s32 %s1941_s17, %s1986_s19  ;;  %s21_s21 = sadd.s32 1, %s1937_s16 }
   0x4   : > { %p19_p0 = scmp.eq.s32.totalorder %s18_s20, 0  ;;  %p28_p1 = scmp.ne.s32.totalorder %s1937_s16, %s1933_s15 }
   0x5   : > { %p29_p2 = scmp.eq.s32.totalorder %s1941_s17, 0  ;;  %p1617_p4 = scmp.ge.s32.totalorder %s1941_s17, 2 }
   0x6   : > { %s1995_s22 = scalar_select %p19_p0, %s1937_s16, %s21_s21  }
   0x7   : > { %p30_p3 = por %p29_p2, %p28_p1  ;;  %152 = sbr.rel (%p1617_p4) target bundleno = 37 (0x25), region = 28 }
   0xe   : > { %155 = sbr.rel (!%p30_p3) target bundleno = 37 (0x25), region = 32  ;;  %s157_s23 = sand.u32 (%p30_p3), 1, %s1937_s16  }
   0xf   : > { %s1717_s24 = smul.u32 (%p30_p3), 72, %s1941_s17 }
  0x10   : > { %s1854_s25 = smul.u32 (%p30_p3), 288, %s157_s23 }
  0x11   : > { %s2003_s28 = scalar_lea.vmem (%p30_p3), %s2486_s0, %s1717_s24 }
  0x12   : > { %v178_v0 = vld [vmem:[%s2003_s28] sm:$0xff] (%p30_p3)   ;;  %v182_v1 = vld [vmem:[%s2003_s28 + $0x8] sm:$0xff] (%p30_p3)   ;;  %v186_v2 = vld [vmem:[%s2003_s28 + $0x10] sm:$0xff] (%p30_p3)   ;;  %s2008_s29 = scalar_lea.vmem (%p30_p3), [#allocation2], %s1854_s25 }
  0x13   : > { %179 = vst [vmem:[%s2008_s29] sm:$0xff] (%p30_p3), %v178_v0   ;;  %183 = vst [vmem:[%s2008_s29 + $0x8] sm:$0xff] (%p30_p3), %v182_v1   ;;  %v190_v3 = vld [vmem:[%s2003_s28 + $0x18] sm:$0xff] (%p30_p3)   ;;  %v194_v4 = vld [vmem:[%s2003_s28 + $0x20] sm:$0xff] (%p30_p3)  }
  0x14   : > { %187 = vst [vmem:[%s2008_s29 + $0x10] sm:$0xff] (%p30_p3), %v186_v2   ;;  %v198_v5 = vld [vmem:[%s2003_s28 + $0x28] sm:$0xff] (%p30_p3)   ;;  %191 = vst [vmem:[%s2008_s29 + $0x18] sm:$0xff] (%p30_p3), %v190_v3   ;;  %v202_v6 = vld [vmem:[%s2003_s28 + $0x30] sm:$0xff] (%p30_p3)  }
  0x15   : > { %195 = vst [vmem:[%s2008_s29 + $0x20] sm:$0xff] %v194_v4   ;;  %199 = vst [vmem:[%s2008_s29 + $0x28] sm:$0xff] %v198_v5   ;;  %v206_v7 = vld [vmem:[%s2003_s28 + $0x38] sm:$0xff]   ;;  %v210_v8 = vld [vmem:[%s2003_s28 + $0x40] sm:$0xff]  }
  0x16   : > { %203 = vst [vmem:[%s2008_s29 + $0x30] sm:$0xff] %v202_v6   ;;  %207 = vst [vmem:[%s2008_s29 + $0x38] sm:$0xff] %v206_v7   ;;  %v214_v9 = vld [vmem:[%s2003_s28 + $0x90] sm:$0xff]   ;;  %v218_v10 = vld [vmem:[%s2003_s28 + $0x98] sm:$0xff]  }
  0x17   : > { %211 = vst [vmem:[%s2008_s29 + $0x40] sm:$0xff] %v210_v8   ;;  %v222_v11 = vld [vmem:[%s2003_s28 + $0xa0] sm:$0xff]   ;;  %215 = vst [vmem:[%s2008_s29 + $0x48] sm:$0xff] %v214_v9   ;;  %v226_v12 = vld [vmem:[%s2003_s28 + $0xa8] sm:$0xff]  }
  0x18   : > { %219 = vst [vmem:[%s2008_s29 + $0x50] sm:$0xff] %v218_v10   ;;  %223 = vst [vmem:[%s2008_s29 + $0x58] sm:$0xff] %v222_v11   ;;  %v230_v13 = vld [vmem:[%s2003_s28 + $0xb0] sm:$0xff]   ;;  %v234_v14 = vld [vmem:[%s2003_s28 + $0xb8] sm:$0xff]  }
  0x19   : > { %227 = vst [vmem:[%s2008_s29 + $0x60] sm:$0xff] %v226_v12   ;;  %231 = vst [vmem:[%s2008_s29 + $0x68] sm:$0xff] %v230_v13   ;;  %v238_v15 = vld [vmem:[%s2003_s28 + $0xc0] sm:$0xff]   ;;  %v242_v16 = vld [vmem:[%s2003_s28 + $0xc8] sm:$0xff]  }
  0x1a   : > { %235 = vst [vmem:[%s2008_s29 + $0x70] sm:$0xff] %v234_v14   ;;  %v246_v17 = vld [vmem:[%s2003_s28 + $0xd0] sm:$0xff]   ;;  %239 = vst [vmem:[%s2008_s29 + $0x78] sm:$0xff] %v238_v15   ;;  %v250_v18 = vld [vmem:[%s2003_s28 + $0x120] sm:$0xff]  }
  0x1b   : > { %243 = vst [vmem:[%s2008_s29 + $0x80] sm:$0xff] %v242_v16   ;;  %247 = vst [vmem:[%s2008_s29 + $0x88] sm:$0xff] %v246_v17   ;;  %v254_v19 = vld [vmem:[%s2003_s28 + $0x128] sm:$0xff]   ;;  %v258_v20 = vld [vmem:[%s2003_s28 + $0x130] sm:$0xff]  }
  0x1c   : > { %251 = vst [vmem:[%s2008_s29 + $0x90] sm:$0xff] %v250_v18   ;;  %255 = vst [vmem:[%s2008_s29 + $0x98] sm:$0xff] %v254_v19   ;;  %v262_v21 = vld [vmem:[%s2003_s28 + $0x138] sm:$0xff]   ;;  %v266_v22 = vld [vmem:[%s2003_s28 + $0x140] sm:$0xff]  }
  0x1d   : > { %259 = vst [vmem:[%s2008_s29 + $0xa0] sm:$0xff] %v258_v20   ;;  %v270_v23 = vld [vmem:[%s2003_s28 + $0x148] sm:$0xff]   ;;  %263 = vst [vmem:[%s2008_s29 + $0xa8] sm:$0xff] %v262_v21   ;;  %v274_v24 = vld [vmem:[%s2003_s28 + $0x150] sm:$0xff]  }
  0x1e   : > { %267 = vst [vmem:[%s2008_s29 + $0xb0] sm:$0xff] %v266_v22   ;;  %271 = vst [vmem:[%s2008_s29 + $0xb8] sm:$0xff] %v270_v23   ;;  %v278_v25 = vld [vmem:[%s2003_s28 + $0x158] sm:$0xff]   ;;  %v282_v26 = vld [vmem:[%s2003_s28 + $0x160] sm:$0xff]  }
  0x1f   : > { %275 = vst [vmem:[%s2008_s29 + $0xc0] sm:$0xff] %v274_v24   ;;  %279 = vst [vmem:[%s2008_s29 + $0xc8] sm:$0xff] %v278_v25   ;;  %v286_v27 = vld [vmem:[%s2003_s28 + $0x1b0] sm:$0xff]   ;;  %v290_v28 = vld [vmem:[%s2003_s28 + $0x1b8] sm:$0xff]  }
  0x20   : > { %283 = vst [vmem:[%s2008_s29 + $0xd0] sm:$0xff] %v282_v26   ;;  %v294_v29 = vld [vmem:[%s2003_s28 + $0x1c0] sm:$0xff]   ;;  %287 = vst [vmem:[%s2008_s29 + $0xd8] sm:$0xff] %v286_v27   ;;  %v298_v30 = vld [vmem:[%s2003_s28 + $0x1c8] sm:$0xff]  }
  0x21   : > { %291 = vst [vmem:[%s2008_s29 + $0xe0] sm:$0xff] %v290_v28   ;;  %295 = vst [vmem:[%s2008_s29 + $0xe8] sm:$0xff] %v294_v29   ;;  %v302_v31 = vld [vmem:[%s2003_s28 + $0x1d0] sm:$0xff]   ;;  %v306_v32 = vld [vmem:[%s2003_s28 + $0x1d8] sm:$0xff]  }
  0x22   : > { %299 = vst [vmem:[%s2008_s29 + $0xf0] sm:$0xff] %v298_v30   ;;  %303 = vst [vmem:[%s2008_s29 + $0xf8] sm:$0xff] %v302_v31   ;;  %v310_v33 = vld [vmem:[%s2003_s28 + $0x1e0] sm:$0xff]   ;;  %v314_v34 = vld [vmem:[%s2003_s28 + $0x1e8] sm:$0xff]  }
  0x23   : > { %307 = vst [vmem:[%s2008_s29 + $0x100] sm:$0xff] %v306_v32   ;;  %v318_v35 = vld [vmem:[%s2003_s28 + $0x1f0] sm:$0xff]   ;;  %311 = vst [vmem:[%s2008_s29 + $0x108] sm:$0xff] %v310_v33  }
  0x24   : > { %315 = vst [vmem:[%s2008_s29 + $0x110] sm:$0xff] %v314_v34   ;;  %319 = vst [vmem:[%s2008_s29 + $0x118] sm:$0xff] %v318_v35  }
  0x25 PF: > { %p1619_p5 = scmp.ge.s32.totalorder %s1941_s17, 1  ;;  %p487_p6 = scmp.lt.s32.totalorder %s1941_s17, 3 }
  0x27   : > { %p488_p7 = pnand %p1619_p5, %p487_p6 }
  0x28   : > { %v1881_v36 = vld [vmem:[%s2487_s1] sm:$0xff] (!%p488_p7)   ;;  %vm903_vm0 = vcmask (!%p488_p7), 1043456   ;;  %v1882_v37 = vld [vmem:[%s2487_s1 + $0x8] sm:$0x1f] (!%p488_p7)   ;;  %vm904_vm1 = vcmask (!%p488_p7), 1044480   ;;  %s494_s8 = sand.u32 (!%p488_p7), 1, %s1933_s15  }
  0x29   : > { %491 = sbr.rel (%p488_p7) target bundleno = 348 (0x15c), region = 73  ;;  %1774 = vmatprep.subr.bf16.mxu0 (!%p488_p7), %v1881_v36  ;;  %1850 = vmatprep.subr.bf16.mxu1 (!%p488_p7), %v1881_v36  ;;  %v1943_v38 = vmov (!%p488_p7), 65535   ;;  %vm794_vm2 = vcmask (!%p488_p7), 203776   ;;  %v2165_v30 = vld [vmem:[%s2488_s2] ss:$0 sm:$0xff] (!%p488_p7)  ;;  %vm1533_vm3 = vcmask (!%p488_p7), 257024  }
  0x2a   : > { %1775 = vmatpush3.bf16.msra.mxu0 (!%p488_p7), %v1881_v36  ;;  %1852 = vmatpush3.bf16.msra.mxu1 (!%p488_p7), %v1881_v36  ;;  %v905_v39 = vsel (!%p488_p7), %vm903_vm0, 4294967295, %v1943_v38  ;;  %s1855_s9 = smul.u32 (!%p488_p7), 288, %s494_s8 }
  0x2b   : > { %v906_v40 = vsel (!%p488_p7), %vm904_vm1, %v905_v39, 0  ;;  %s2219_s15 = smul.u32 (!%p488_p7), 18, %s1614_s18 }
  0x2c   : > { %v908_v41 = vand.u32 (!%p488_p7), %v1882_v37, %v906_v40  ;;  %s2088_s10 = scalar_lea.vmem (!%p488_p7), [#allocation2], %s1855_s9 }
  0x2d   : > { %v1883_v42 = vld [vmem:[%s2088_s10] sm:$0xff] (!%p488_p7)   ;;  %v1884_v43 = vld [vmem:[%s2088_s10 + $0x90] sm:$0xff] (!%p488_p7)   ;;  %v1885_v44 = vld [vmem:[%s2088_s10 + $0x8] sm:$0xff] (!%p488_p7)   ;;  %p521_p8 = scmp.lt.s32.totalorder (!%p488_p7), %s2219_s15, 35 }
  0x2e   : > { %1776 = vmatprep.subr.bf16.mxu0 (!%p488_p7), %v908_v41  ;;  %1851 = vmatprep.subr.bf16.mxu1 (!%p488_p7), %v908_v41  ;;  %v1886_v45 = vld [vmem:[%s2088_s10 + $0x98] sm:$0xff] (!%p488_p7)   ;;  %v1887_v46 = vld [vmem:[%s2088_s10 + $0x10] sm:$0xff] (!%p488_p7)   ;;  %v1888_v47 = vld [vmem:[%s2088_s10 + $0xa0] sm:$0xff] (!%p488_p7)  }
  0x2f   : > { %1777 = vmatpush3.bf16.msra.mxu0 (!%p488_p7), %v908_v41  ;;  %1853 = vmatpush3.bf16.msra.mxu1 (!%p488_p7), %v908_v41  ;;  %v1889_v48 = vld [vmem:[%s2088_s10 + $0x18] sm:$0xff] (!%p488_p7)   ;;  %v1890_v49 = vld [vmem:[%s2088_s10 + $0xa8] sm:$0xff] (!%p488_p7)   ;;  %v1891_v50 = vld [vmem:[%s2088_s10 + $0x20] sm:$0xff] (!%p488_p7)  }
  0x30   : > { %1778 = vmatprep.mubr.msk.bf16.mxu0 %vm794_vm2, %v1883_v42  ;;  %1814 = vmatprep.mubr.msk.bf16.mxu1 %vm794_vm2, %v1884_v43  ;;  %v1892_v51 = vld [vmem:[%s2088_s10 + $0xb0] sm:$0xff]   ;;  %v1893_v52 = vld [vmem:[%s2088_s10 + $0x28] sm:$0xff]   ;;  %v1894_v53 = vld [vmem:[%s2088_s10 + $0xb8] sm:$0xff]   ;;  %s2495_s15 = smov (!%p521_p8, %s2219_s15), 35 }
  0x31   : > { %v1895_v54 = vld [vmem:[%s2088_s10 + $0x30] sm:$0xff]   ;;  %v1896_v55 = vld [vmem:[%s2088_s10 + $0xc0] sm:$0xff]   ;;  %v1897_v56 = vld [vmem:[%s2088_s10 + $0x38] sm:$0xff]   ;;  %s1620_s17 = sshll.u32 %s2495_s15, 2 }
  0x32   : > { %1779 = vmatmul.mubr.msk.bf16.vlgmr.msra.gmra.mrb[0].mxu0 %vm794_vm2, %v1885_v44  ;;  %1815 = vmatmul.mubr.msk.bf16.vlgmr.msra.gmra.mrb[0].mxu1 %vm794_vm2, %v1886_v45  ;;  %v1898_v57 = vld [vmem:[%s2088_s10 + $0xc8] sm:$0xff]   ;;  %v1899_v58 = vld [vmem:[%s2088_s10 + $0x40] sm:$0xff]   ;;  %v1900_v59 = vld [vmem:[%s2088_s10 + $0xd0] sm:$0xff]   ;;  %s2332_s21 = scalar_lea.vmem %s2490_s4, %s1620_s17 }
  0x33   : > { %1782 = vmatprep.mubr.msk.bf16.mxu0 %vm794_vm2, %v1887_v46  ;;  %1818 = vmatprep.mubr.msk.bf16.mxu1 %vm794_vm2, %v1888_v47  ;;  %v1901_v60 = vld [vmem:[%s2088_s10 + $0x48] sm:$0xff]   ;;  %v1902_v61 = vld [vmem:[%s2088_s10 + $0xd8] sm:$0xff]   ;;  %v1903_v62 = vld [vmem:[%s2088_s10 + $0x50] sm:$0xff]  }
  0x34   : > { %v1904_v63 = vld [vmem:[%s2088_s10 + $0xe0] sm:$0xff]   ;;  %v1905_v0 = vld [vmem:[%s2088_s10 + $0x58] sm:$0xff]   ;;  %v1906_v1 = vld [vmem:[%s2088_s10 + $0xe8] sm:$0xff]  }
  0x35   : > { %v1907_v2 = vld [vmem:[%s2088_s10 + $0x60] sm:$0xff]   ;;  %v1908_v3 = vld [vmem:[%s2088_s10 + $0xf0] sm:$0xff]   ;;  %v1909_v4 = vld [vmem:[%s2088_s10 + $0x68] sm:$0xff]  }
  0x36   : > { %v1910_v5 = vld [vmem:[%s2088_s10 + $0xf8] sm:$0xff]   ;;  %v1911_v6 = vld [vmem:[%s2088_s10 + $0x70] sm:$0xff]   ;;  %v1912_v7 = vld [vmem:[%s2088_s10 + $0x100] sm:$0xff]  }
  0x37   : > { %v1913_v8 = vld [vmem:[%s2088_s10 + $0x78] sm:$0xff]   ;;  %v1914_v9 = vld [vmem:[%s2088_s10 + $0x108] sm:$0xff]   ;;  %v1915_v10 = vld [vmem:[%s2088_s10 + $0x80] sm:$0xff]  }
  0x38   : > { %v1916_v11 = vld [vmem:[%s2088_s10 + $0x110] sm:$0xff]   ;;  %v1917_v12 = vld [vmem:[%s2088_s10 + $0x88] sm:$0xff]   ;;  %v1918_v13 = vld [vmem:[%s2088_s10 + $0x118] sm:$0xff]  }
  0x39   : > { %v2172_v41 = vld [vmem:[%s2489_s3] ss:$0 sm:$0xff] }
  0x3a   : > { %1783 = vmatmul.mubr.msk.bf16.gmra.mrb[4].mxu0 %vm794_vm2, %v1889_v48  ;;  %1819 = vmatmul.mubr.msk.bf16.gmra.mrb[4].mxu1 %vm794_vm2, %v1890_v49 }
  0x3b   : > { %1786 = vmatprep.mubr.msk.bf16.mxu0 %vm794_vm2, %v1891_v50  ;;  %1822 = vmatprep.mubr.msk.bf16.mxu1 %vm794_vm2, %v1892_v51 }
  0x42   : > { %1787 = vmatmul.mubr.msk.bf16.gmra.mrb[8].mxu0 %vm794_vm2, %v1893_v52  ;;  %1823 = vmatmul.mubr.msk.bf16.gmra.mrb[8].mxu1 %vm794_vm2, %v1894_v53 }
  0x43   : > { %1790 = vmatprep.mubr.msk.bf16.mxu0 %vm794_vm2, %v1895_v54  ;;  %1826 = vmatprep.mubr.msk.bf16.mxu1 %vm794_vm2, %v1896_v55 }
  0x4a   : > { %1791 = vmatmul.mubr.msk.bf16.gmra.mrb[12].mxu0 %vm794_vm2, %v1897_v56  ;;  %1827 = vmatmul.mubr.msk.bf16.gmra.mrb[12].mxu1 %vm794_vm2, %v1898_v57 }
  0x4b   : > { %1794 = vmatprep.mubr.msk.bf16.mxu0 %vm794_vm2, %v1899_v58  ;;  %1830 = vmatprep.mubr.msk.bf16.mxu1 %vm794_vm2, %v1900_v59 }
  0x52   : > { %1795 = vmatmul.mubr.msk.bf16.gmra.mrb[16].mxu0 %vm794_vm2, %v1901_v60  ;;  %1831 = vmatmul.mubr.msk.bf16.gmra.mrb[16].mxu1 %vm794_vm2, %v1902_v61 }
  0x53   : > { %1798 = vmatprep.mubr.msk.bf16.mxu0 %vm794_vm2, %v1903_v62  ;;  %1834 = vmatprep.mubr.msk.bf16.mxu1 %vm794_vm2, %v1904_v63 }
  0x5a   : > { %1799 = vmatmul.mubr.msk.bf16.gmra.mrb[20].mxu0 %vm794_vm2, %v1905_v0  ;;  %1835 = vmatmul.mubr.msk.bf16.gmra.mrb[20].mxu1 %vm794_vm2, %v1906_v1 }
  0x5b   : > { %1802 = vmatprep.mubr.msk.bf16.mxu0 %vm794_vm2, %v1907_v2  ;;  %1838 = vmatprep.mubr.msk.bf16.mxu1 %vm794_vm2, %v1908_v3 }
  0x62   : > { %1803 = vmatmul.mubr.msk.bf16.gmra.mrb[24].mxu0 %vm794_vm2, %v1909_v4  ;;  %1839 = vmatmul.mubr.msk.bf16.gmra.mrb[24].mxu1 %vm794_vm2, %v1910_v5 }
  0x63   : > { %1806 = vmatprep.mubr.msk.bf16.mxu0 %vm794_vm2, %v1911_v6  ;;  %1842 = vmatprep.mubr.msk.bf16.mxu1 %vm794_vm2, %v1912_v7 }
  0x6a   : > { %1807 = vmatmul.mubr.msk.bf16.gmra.mrb[28].mxu0 %vm794_vm2, %v1913_v8  ;;  %1843 = vmatmul.mubr.msk.bf16.gmra.mrb[28].mxu1 %vm794_vm2, %v1914_v9 }
  0x6b   : > { %1810 = vmatprep.mubr.msk.bf16.mxu0 %vm794_vm2, %v1915_v10  ;;  %1846 = vmatprep.mubr.msk.bf16.mxu1 %vm794_vm2, %v1916_v11 }
  0x72   : > { %1811 = vmatmul.mubr.msk.bf16.gmra.mrb[32].mxu0 %vm794_vm2, %v1917_v12  ;;  %1847 = vmatmul.mubr.msk.bf16.gmra.mrb[32].mxu1 %vm794_vm2, %v1918_v13 }
 0x105   : > { %v1780_v14 = vpop.f32.mrb[0].mxu0  ;;  %v1816_v15 = vpop.f32.mrb[0].mxu1 }
 0x106   : > { %v944_v16 = vpop.f32.mrb[1].mxu0  ;;  %v1088_v17 = vpop.f32.mrb[1].mxu1  ;;  %v1240_v37 = vmul.f32 %v1780_v14, %v2165_v30  ;;  %v1276_v38 = vmul.f32 %v1816_v15, %v2165_v30 }
 0x107   : > { %v1781_v18 = vpop.f32.mrb[2].mxu0  ;;  %v1817_v19 = vpop.f32.mrb[2].mxu1  ;;  %v1238_v42 = vmul.f32 %v2165_v30, %v944_v16  ;;  %v1274_v43 = vmul.f32 %v2165_v30, %v1088_v17 }
 0x108   : > { %v947_v20 = vpop.f32.mrb[3].mxu0  ;;  %v1091_v21 = vpop.f32.mrb[3].mxu1  ;;  %v1241_v44 = vmul.f32 %v1781_v18, %v2165_v30  ;;  %v1277_v45 = vmul.f32 %v1817_v19, %v2165_v30  ;;  %v2182_v49 = vadd.f32 %v2172_v41, %v1240_v37  ;;  %v2185_v50 = vadd.f32 %v2172_v41, %v1276_v38 }
 0x109   : > { %v1239_v46 = vmul.f32 %v2165_v30, %v947_v20  ;;  %v1275_v47 = vmul.f32 %v2165_v30, %v1091_v21  ;;  %v2188_v51 = vadd.f32 %v2172_v41, %v1238_v42  ;;  %v2191_v52 = vadd.f32 %v2172_v41, %v1274_v43 }
 0x10a   : > { %v2194_v53 = vadd.f32 %v2172_v41, %v1241_v44  ;;  %v2197_v54 = vadd.f32 %v2172_v41, %v1277_v45 }
 0x10b   : > { %v2200_v57 = vadd.f32 %v2172_v41, %v1239_v46  ;;  %v2203_v58 = vadd.f32 %v2172_v41, %v1275_v47 }
 0x10d   : > { %v1784_v22 = vpop.f32.mrb[4].mxu0  ;;  %v1820_v23 = vpop.f32.mrb[4].mxu1 }
 0x10e   : > { %v960_v24 = vpop.f32.mrb[5].mxu0  ;;  %v1104_v25 = vpop.f32.mrb[5].mxu1  ;;  %v1244_v48 = vmul.f32 %v1784_v22, %v2165_v30  ;;  %v1280_v59 = vmul.f32 %v1820_v23, %v2165_v30 }
 0x10f   : > { %v1785_v26 = vpop.f32.mrb[6].mxu0  ;;  %v1821_v27 = vpop.f32.mrb[6].mxu1  ;;  %v1242_v60 = vmul.f32 %v2165_v30, %v960_v24  ;;  %v1278_v0 = vmul.f32 %v2165_v30, %v1104_v25 }
 0x110   : > { %v963_v28 = vpop.f32.mrb[7].mxu0  ;;  %v1107_v29 = vpop.f32.mrb[7].mxu1  ;;  %v2208_v63 = vadd.f32 %v2172_v41, %v1244_v48  ;;  %v1245_v1 = vmul.f32 %v1785_v26, %v2165_v30  ;;  %v1281_v2 = vmul.f32 %v1821_v27, %v2165_v30  ;;  %v2226_v15 = vadd.f32 %v2172_v41, %v1280_v59 }
 0x111   : > { %v1243_v5 = vmul.f32 %v2165_v30, %v963_v28  ;;  %v1279_v6 = vmul.f32 %v2165_v30, %v1107_v29  ;;  %v2229_v16 = vadd.f32 %v2172_v41, %v1242_v60  ;;  %v2234_v19 = vadd.f32 %v2172_v41, %v1278_v0 }
 0x112   : > { %v2237_v20 = vadd.f32 %v2172_v41, %v1245_v1  ;;  %v2240_v21 = vadd.f32 %v2172_v41, %v1281_v2 }
 0x113   : > { %v2244_v23 = vadd.f32 %v2172_v41, %v1243_v5  ;;  %v2247_v24 = vadd.f32 %v2172_v41, %v1279_v6 }
 0x115   : > { %v1788_v31 = vpop.f32.mrb[8].mxu0  ;;  %v1824_v32 = vpop.f32.mrb[8].mxu1 }
 0x116   : > { %v976_v33 = vpop.f32.mrb[9].mxu0  ;;  %v1120_v34 = vpop.f32.mrb[9].mxu1  ;;  %v1248_v7 = vmul.f32 %v1788_v31, %v2165_v30  ;;  %v1284_v8 = vmul.f32 %v1824_v32, %v2165_v30 }
 0x117   : > { %v1789_v35 = vpop.f32.mrb[10].mxu0  ;;  %v1825_v36 = vpop.f32.mrb[10].mxu1  ;;  %v1246_v11 = vmul.f32 %v2165_v30, %v976_v33  ;;  %v1282_v12 = vmul.f32 %v2165_v30, %v1120_v34 }
 0x118   : > { %v979_v39 = vpop.f32.mrb[11].mxu0  ;;  %v1123_v40 = vpop.f32.mrb[11].mxu1  ;;  %v1249_v13 = vmul.f32 %v1789_v35, %v2165_v30  ;;  %v1285_v14 = vmul.f32 %v1825_v36, %v2165_v30  ;;  %v2250_v25 = vadd.f32 %v2172_v41, %v1248_v7  ;;  %v2253_v26 = vadd.f32 %v2172_v41, %v1284_v8 }
 0x119   : > { %v1247_v17 = vmul.f32 %v2165_v30, %v979_v39  ;;  %v1283_v18 = vmul.f32 %v2165_v30, %v1123_v40  ;;  %v2257_v27 = vadd.f32 %v2172_v41, %v1246_v11  ;;  %v2260_v28 = vadd.f32 %v2172_v41, %v1282_v12 }
 0x11a   : > { %v2263_v29 = vadd.f32 %v2172_v41, %v1249_v13  ;;  %v2266_v31 = vadd.f32 %v2172_v41, %v1285_v14 }
 0x11b   : > { %v2269_v34 = vadd.f32 %v2172_v41, %v1247_v17  ;;  %v2272_v35 = vadd.f32 %v2172_v41, %v1283_v18 }
 0x11d   : > { %v1792_v55 = vpop.f32.mrb[12].mxu0  ;;  %v1828_v56 = vpop.f32.mrb[12].mxu1 }
 0x11e   : > { %v992_v61 = vpop.f32.mrb[13].mxu0  ;;  %v1136_v62 = vpop.f32.mrb[13].mxu1  ;;  %v1252_v22 = vmul.f32 %v1792_v55, %v2165_v30  ;;  %v1288_v42 = vmul.f32 %v1828_v56, %v2165_v30 }
 0x11f   : > { %v1793_v3 = vpop.f32.mrb[14].mxu0  ;;  %v1829_v4 = vpop.f32.mrb[14].mxu1  ;;  %v1250_v43 = vmul.f32 %v2165_v30, %v992_v61  ;;  %v1286_v44 = vmul.f32 %v2165_v30, %v1136_v62 }
 0x120   : > { %v995_v9 = vpop.f32.mrb[15].mxu0  ;;  %v1139_v10 = vpop.f32.mrb[15].mxu1  ;;  %v2277_v40 = vadd.f32 %v2172_v41, %v1252_v22  ;;  %v1253_v61 = vmul.f32 %v1793_v3, %v2165_v30  ;;  %v2300_v8 = vadd.f32 %v2172_v41, %v1288_v42  ;;  %v2306_v3 = vmul.f32 %v1829_v4, %v2165_v30 }
 0x121   : > { %v1251_v62 = vmul.f32 %v2165_v30, %v995_v9  ;;  %v1287_v0 = vmul.f32 %v2165_v30, %v1139_v10  ;;  %v2303_v11 = vadd.f32 %v2172_v41, %v1250_v43  ;;  %v2310_v10 = vadd.f32 %v2172_v41, %v1286_v44 }
 0x122   : > { %v2316_v13 = vadd.f32 %v2172_v41, %v1253_v61 }
 0x123   : > { %v2319_v14 = vadd.f32 %v2172_v41, %v1251_v62  ;;  %v2322_v4 = vadd.f32 %v2172_v41, %v1287_v0 }
 0x125   : > { %v1796_v32 = vpop.f32.mrb[16].mxu0  ;;  %v1832_v33 = vpop.f32.mrb[16].mxu1 }
 0x126   : > { %v1256_v36 = vmul.f32 %v1796_v32, %v2165_v30  ;;  %v1292_v37 = vmul.f32 %v1832_v33, %v2165_v30  ;;  %v1008_v38 = vpop.f32.mrb[17].mxu0  ;;  %v1152_v39 = vpop.f32.mrb[17].mxu1 }
 0x127   : > { %v1797_v45 = vpop.f32.mrb[18].mxu0  ;;  %v1833_v46 = vpop.f32.mrb[18].mxu1  ;;  %v1254_v1 = vmul.f32 %v2165_v30, %v1008_v38  ;;  %v1290_v9 = vmul.f32 %v2165_v30, %v1152_v39 }
 0x128   : > { %v1335_v47 = vadd.f32 %v2172_v41, %v1256_v36  ;;  %v1371_v48 = vadd.f32 %v2172_v41, %v1292_v37  ;;  %v1257_v55 = vmul.f32 %v1797_v45, %v2165_v30  ;;  %v1293_v59 = vmul.f32 %v1833_v46, %v2165_v30  ;;  %v1011_v56 = vpop.f32.mrb[19].mxu0  ;;  %v1155_v60 = vpop.f32.mrb[19].mxu1 }
 0x129   : > { %v2325_v17 = vadd.f32 %v2172_v41, %v1254_v1  ;;  %v2335_v38 = vadd.f32 %v2172_v41, %v1290_v9  ;;  %v1255_v39 = vmul.f32 %v2165_v30, %v1011_v56 }
 0x12a   : > { %v1389_v2 = vmax.f32 %v2188_v51, %v1335_v47  ;;  %v1407_v5 = vmax.f32 %v2191_v52, %v1371_v48  ;;  %v1336_v6 = vadd.f32 %v2172_v41, %v1257_v55  ;;  %v1372_v7 = vadd.f32 %v2172_v41, %v1293_v59 }
 0x12c   : > { %v1425_v51 = vmax.f32 %v1389_v2, %v1407_v5  ;;  %v1390_v52 = vmax.f32 %v2200_v57, %v1336_v6  ;;  %v1408_v12 = vmax.f32 %v2203_v58, %v1372_v7 }
 0x12d   : > { %v1800_v18 = vpop.f32.mrb[20].mxu0  ;;  %v1836_v22 = vpop.f32.mrb[20].mxu1 }
 0x12e   : > { %v1443_v32 = vmax.f32 %v1425_v51, 0.0  ;;  %v1426_v33 = vmax.f32 %v1390_v52, %v1408_v12  ;;  %v1260_v57 = vmul.f32 %v1800_v18, %v2165_v30  ;;  %v1296_v58 = vmul.f32 %v1836_v22, %v2165_v30  ;;  %v1024_v36 = vpop.f32.mrb[21].mxu0  ;;  %v1168_v37 = vpop.f32.mrb[21].mxu1 }
 0x12f   : > { %v1258_v42 = vmul.f32 %v2165_v30, %v1024_v36  ;;  %v1294_v43 = vmul.f32 %v2165_v30, %v1168_v37  ;;  %v1801_v44 = vpop.f32.mrb[22].mxu0  ;;  %v1837_v45 = vpop.f32.mrb[22].mxu1  ;;  %v1291_v18 = vmul.f32 %v2165_v30, %v1155_v60 }
 0x130   : > { %v1718_v46 = vpack.c.bf16 %v1443_v32, %v1443_v32  ;;  %v1444_v47 = vmax.f32 %v1426_v33, 0.0  ;;  %v1339_v48 = vadd.f32 %v2172_v41, %v1260_v57  ;;  %v1375_v55 = vadd.f32 %v2172_v41, %v1296_v58  ;;  %v1027_v59 = vpop.f32.mrb[23].mxu0  ;;  %v1171_v61 = vpop.f32.mrb[23].mxu1 }
 0x131   : > { %v1337_v62 = vadd.f32 %v2172_v41, %v1258_v42  ;;  %v1373_v0 = vadd.f32 %v2172_v41, %v1294_v43  ;;  %v1261_v56 = vmul.f32 %v1801_v44, %v2165_v30  ;;  %v1297_v1 = vmul.f32 %v1837_v45, %v2165_v30 }
 0x132   : > { %1534 = vst.msk [vmem:[%s2332_s21] sm:$0xf] %vm1533_vm3, %v1718_v46  ;;  %v1719_v2 = vpack.c.bf16 %v1444_v47, %v1444_v47  ;;  %v1393_v5 = vmax.f32 %v2229_v16, %v1339_v48  ;;  %v1411_v6 = vmax.f32 %v2234_v19, %v1375_v55  ;;  %v1259_v7 = vmul.f32 %v2165_v30, %v1027_v59 }
 0x133   : > { %v1391_v9 = vmax.f32 %v2182_v49, %v1337_v62  ;;  %v1409_v51 = vmax.f32 %v2185_v50, %v1373_v0  ;;  %v1340_v52 = vadd.f32 %v2172_v41, %v1261_v56  ;;  %v1376_v12 = vadd.f32 %v2172_v41, %v1297_v1 }
 0x134   : > { %1535 = vst.msk [vmem:[%s2332_s21 + $0x4] sm:$0xf] %vm1533_vm3, %v1719_v2  ;;  %v1429_v22 = vmax.f32 %v1393_v5, %v1411_v6  ;;  %v1338_v32 = vadd.f32 %v2172_v41, %v1259_v7  ;;  %v1295_v16 = vmul.f32 %v2165_v30, %v1171_v61  ;;  %v2361_v19 = vadd.f32 %v2172_v41, %v1255_v39 }
 0x135   : > { %v1427_v33 = vmax.f32 %v1391_v9, %v1409_v51  ;;  %v1394_v49 = vmax.f32 %v2244_v23, %v1340_v52  ;;  %v1412_v50 = vmax.f32 %v2247_v24, %v1376_v12  ;;  %v1804_v57 = vpop.f32.mrb[24].mxu0  ;;  %v1840_v58 = vpop.f32.mrb[24].mxu1 }
 0x136   : > { %v1447_v36 = vmax.f32 %v1429_v22, 0.0  ;;  %v1392_v37 = vmax.f32 %v2194_v53, %v1338_v32  ;;  %v1374_v60 = vadd.f32 %v2172_v41, %v1295_v16  ;;  %v1264_v42 = vmul.f32 %v1804_v57, %v2165_v30  ;;  %v1040_v43 = vpop.f32.mrb[25].mxu0  ;;  %v1184_v44 = vpop.f32.mrb[25].mxu1 }
 0x137   : > { %v1445_v45 = vmax.f32 %v1427_v33, 0.0  ;;  %v1430_v39 = vmax.f32 %v1394_v49, %v1412_v50  ;;  %v1300_v46 = vmul.f32 %v1840_v58, %v2165_v30  ;;  %v1262_v23 = vmul.f32 %v2165_v30, %v1040_v43  ;;  %v1805_v47 = vpop.f32.mrb[26].mxu0  ;;  %v1841_v24 = vpop.f32.mrb[26].mxu1 }
 0x138   : > { %v1722_v48 = vpack.c.bf16 %v1447_v36, %v1447_v36  ;;  %v1410_v55 = vmax.f32 %v2197_v54, %v1374_v60  ;;  %v1343_v53 = vadd.f32 %v2172_v41, %v1264_v42  ;;  %v1298_v59 = vmul.f32 %v2165_v30, %v1184_v44  ;;  %v1043_v61 = vpop.f32.mrb[27].mxu0  ;;  %v1187_v62 = vpop.f32.mrb[27].mxu1 }
 0x139   : > { %v1720_v0 = vpack.c.bf16 %v1445_v45, %v1445_v45  ;;  %v1448_v56 = vmax.f32 %v1430_v39, 0.0  ;;  %v1379_v1 = vadd.f32 %v2172_v41, %v1300_v46  ;;  %v1341_v2 = vadd.f32 %v2172_v41, %v1262_v23 }
 0x13a   : > { %1538 = vst.msk [vmem:[%s2332_s21 + $0x10] sm:$0xf] %vm1533_vm3, %v1722_v48  ;;  %v1428_v5 = vmax.f32 %v1392_v37, %v1410_v55  ;;  %v1397_v6 = vmax.f32 %v2257_v27, %v1343_v53  ;;  %v1377_v54 = vadd.f32 %v2172_v41, %v1298_v59  ;;  %v1265_v7 = vmul.f32 %v1805_v47, %v2165_v30 }
 0x13b   : > { %1536 = vst.msk [vmem:[%s2332_s21 + $0x8] sm:$0xf] %vm1533_vm3, %v1720_v0  ;;  %v1723_v9 = vpack.c.bf16 %v1448_v56, %v1448_v56  ;;  %v1415_v51 = vmax.f32 %v2260_v28, %v1379_v1  ;;  %v1395_v52 = vmax.f32 %v2208_v63, %v1341_v2  ;;  %v1301_v12 = vmul.f32 %v1841_v24, %v2165_v30 }
 0x13c   : > { %v1446_v22 = vmax.f32 %v1428_v5, 0.0  ;;  %v1413_v32 = vmax.f32 %v2226_v15, %v1377_v54  ;;  %v1344_v16 = vadd.f32 %v2172_v41, %v1265_v7  ;;  %v1263_v27 = vmul.f32 %v2165_v30, %v1043_v61 }
 0x13d   : > { %v2389_v33 = vadd.f32 %v2172_v41, %v1291_v18  ;;  %1539 = vst.msk [vmem:[%s2332_s21 + $0x14] sm:$0xf] %vm1533_vm3, %v1723_v9  ;;  %v1433_v49 = vmax.f32 %v1397_v6, %v1415_v51  ;;  %v1380_v50 = vadd.f32 %v2172_v41, %v1301_v12  ;;  %v1299_v63 = vmul.f32 %v2165_v30, %v1187_v62  ;;  %v1808_v28 = vpop.f32.mrb[28].mxu0  ;;  %v1844_v57 = vpop.f32.mrb[28].mxu1 }
 0x13e   : > { %v1721_v58 = vpack.c.bf16 %v1446_v22, %v1446_v22  ;;  %v1431_v36 = vmax.f32 %v1395_v52, %v1413_v32  ;;  %v1398_v15 = vmax.f32 %v2269_v34, %v1344_v16  ;;  %v1342_v37 = vadd.f32 %v2172_v41, %v1263_v27  ;;  %v1056_v60 = vpop.f32.mrb[29].mxu0  ;;  %v1200_v42 = vpop.f32.mrb[29].mxu1 }
 0x13f   : > { %v1451_v18 = vmax.f32 %v1433_v49, 0.0  ;;  %v1416_v43 = vmax.f32 %v2272_v35, %v1380_v50  ;;  %v1378_v44 = vadd.f32 %v2172_v41, %v1299_v63  ;;  %v1268_v45 = vmul.f32 %v1808_v28, %v2165_v30  ;;  %v1809_v39 = vpop.f32.mrb[30].mxu0  ;;  %v1845_v46 = vpop.f32.mrb[30].mxu1 }
 0x140   : > { %1537 = vst.msk [vmem:[%s2332_s21 + $0xc] sm:$0xf] %vm1533_vm3, %v1721_v58  ;;  %v1449_v23 = vmax.f32 %v1431_v36, 0.0  ;;  %v1396_v47 = vmax.f32 %v2237_v20, %v1342_v37  ;;  %v1304_v34 = vmul.f32 %v1844_v57, %v2165_v30  ;;  %v1266_v24 = vmul.f32 %v2165_v30, %v1056_v60  ;;  %v1059_v48 = vpop.f32.mrb[31].mxu0  ;;  %v1203_v55 = vpop.f32.mrb[31].mxu1 }
 0x141   : > { %v1726_v35 = vpack.c.bf16 %v1451_v18, %v1451_v18  ;;  %v1434_v53 = vmax.f32 %v1398_v15, %v1416_v43  ;;  %v1414_v59 = vmax.f32 %v2240_v21, %v1378_v44  ;;  %v1347_v61 = vadd.f32 %v2172_v41, %v1268_v45 }
 0x142   : > { %v1724_v62 = vpack.c.bf16 %v1449_v23, %v1449_v23  ;;  %v1383_v0 = vadd.f32 %v2172_v41, %v1304_v34  ;;  %v1345_v56 = vadd.f32 %v2172_v41, %v1266_v24  ;;  %v1302_v20 = vmul.f32 %v2165_v30, %v1200_v42 }
 0x143   : > { %1542 = vst.msk [vmem:[%s2332_s21 + $0x20] sm:$0xf] %vm1533_vm3, %v1726_v35  ;;  %v1452_v1 = vmax.f32 %v1434_v53, 0.0  ;;  %v1432_v2 = vmax.f32 %v1396_v47, %v1414_v59  ;;  %v1401_v5 = vmax.f32 %v2303_v11, %v1347_v61  ;;  %v1269_v6 = vmul.f32 %v1809_v39, %v2165_v30 }
 0x144   : > { %1540 = vst.msk [vmem:[%s2332_s21 + $0x18] sm:$0xf] %vm1533_vm3, %v1724_v62  ;;  %v1419_v21 = vmax.f32 %v2310_v10, %v1383_v0  ;;  %v1399_v54 = vmax.f32 %v2250_v25, %v1345_v56  ;;  %v1381_v7 = vadd.f32 %v2172_v41, %v1302_v20  ;;  %v1305_v9 = vmul.f32 %v1845_v46, %v2165_v30 }
 0x145   : > { %v1727_v51 = vpack.c.bf16 %v1452_v1, %v1452_v1  ;;  %v1450_v52 = vmax.f32 %v1432_v2, 0.0  ;;  %v1348_v12 = vadd.f32 %v2172_v41, %v1269_v6  ;;  %v1267_v22 = vmul.f32 %v2165_v30, %v1059_v48  ;;  %v1812_v11 = vpop.f32.mrb[32].mxu0  ;;  %v1848_v32 = vpop.f32.mrb[32].mxu1 }
 0x146   : > { %v1437_v16 = vmax.f32 %v1401_v5, %v1419_v21  ;;  %v1417_v27 = vmax.f32 %v2253_v26, %v1381_v7  ;;  %v1384_v10 = vadd.f32 %v2172_v41, %v1305_v9  ;;  %v1303_v49 = vmul.f32 %v2165_v30, %v1203_v55  ;;  %v1072_v25 = vpop.f32.mrb[33].mxu0  ;;  %v1216_v50 = vpop.f32.mrb[33].mxu1 }
 0x147   : > { %1543 = vst.msk [vmem:[%s2332_s21 + $0x24] sm:$0xf] %vm1533_vm3, %v1727_v51  ;;  %v1725_v63 = vpack.c.bf16 %v1450_v52, %v1450_v52  ;;  %v1402_v28 = vmax.f32 %v2319_v14, %v1348_v12  ;;  %v1346_v57 = vadd.f32 %v2172_v41, %v1267_v22  ;;  %v1272_v58 = vmul.f32 %v1812_v11, %v2165_v30  ;;  %v1813_v36 = vpop.f32.mrb[34].mxu0  ;;  %v1849_v15 = vpop.f32.mrb[34].mxu1 }
 0x148   : > { %v1455_v37 = vmax.f32 %v1437_v16, 0.0  ;;  %v1435_v26 = vmax.f32 %v1399_v54, %v1417_v27  ;;  %v1420_v60 = vmax.f32 %v2322_v4, %v1384_v10  ;;  %v1382_v42 = vadd.f32 %v2172_v41, %v1303_v49  ;;  %v1075_v18 = vpop.f32.mrb[35].mxu0  ;;  %v1219_v43 = vpop.f32.mrb[35].mxu1 }
 0x149   : > { %1541 = vst.msk [vmem:[%s2332_s21 + $0x1c] sm:$0xf] %vm1533_vm3, %v1725_v63  ;;  %v1400_v44 = vmax.f32 %v2263_v29, %v1346_v57  ;;  %v1351_v14 = vadd.f32 %v2172_v41, %v1272_v58  ;;  %v1308_v45 = vmul.f32 %v1848_v32, %v2165_v30  ;;  %v1270_v39 = vmul.f32 %v2165_v30, %v1072_v25 }
 0x14a   : > { %v1730_v46 = vpack.c.bf16 %v1455_v37, %v1455_v37  ;;  %v1453_v23 = vmax.f32 %v1435_v26, 0.0  ;;  %v1438_v47 = vmax.f32 %v1402_v28, %v1420_v60  ;;  %v1418_v4 = vmax.f32 %v2266_v31, %v1382_v42 }
 0x14b   : > { %v1405_v34 = vmax.f32 %v2325_v17, %v1351_v14  ;;  %v1387_v24 = vadd.f32 %v2172_v41, %v1308_v45  ;;  %v1349_v48 = vadd.f32 %v2172_v41, %v1270_v39  ;;  %v1306_v29 = vmul.f32 %v2165_v30, %v1216_v50 }
 0x14c   : > { %1546 = vst.msk [vmem:[%s2332_s21 + $0x30] sm:$0xf] %vm1533_vm3, %v1730_v46  ;;  %v1728_v55 = vpack.c.bf16 %v1453_v23, %v1453_v23  ;;  %v1456_v35 = vmax.f32 %v1438_v47, 0.0  ;;  %v1436_v53 = vmax.f32 %v1400_v44, %v1418_v4  ;;  %v1273_v59 = vmul.f32 %v1813_v36, %v2165_v30 }
 0x14d   : > { %v1423_v61 = vmax.f32 %v2335_v38, %v1387_v24  ;;  %v1403_v31 = vmax.f32 %v2277_v40, %v1349_v48  ;;  %v1385_v17 = vadd.f32 %v2172_v41, %v1306_v29  ;;  %v1309_v62 = vmul.f32 %v1849_v15, %v2165_v30 }
 0x14e   : > { %1544 = vst.msk [vmem:[%s2332_s21 + $0x28] sm:$0xf] %vm1533_vm3, %v1728_v55  ;;  %v1731_v0 = vpack.c.bf16 %v1456_v35, %v1456_v35  ;;  %v1454_v56 = vmax.f32 %v1436_v53, 0.0  ;;  %v1352_v20 = vadd.f32 %v2172_v41, %v1273_v59  ;;  %v1271_v1 = vmul.f32 %v2165_v30, %v1075_v18 }
 0x14f   : > { %v1441_v2 = vmax.f32 %v1405_v34, %v1423_v61  ;;  %v1421_v5 = vmax.f32 %v2300_v8, %v1385_v17  ;;  %v1388_v38 = vadd.f32 %v2172_v41, %v1309_v62  ;;  %v1307_v40 = vmul.f32 %v2165_v30, %v1219_v43 }
 0x150   : > { %v1368_v6 = vadd.f32 %v2172_v41, %v2306_v3  ;;  %1547 = vst.msk [vmem:[%s2332_s21 + $0x34] sm:$0xf] %vm1533_vm3, %v1731_v0  ;;  %v1729_v21 = vpack.c.bf16 %v1454_v56, %v1454_v56  ;;  %v1406_v54 = vmax.f32 %v2361_v19, %v1352_v20  ;;  %v1350_v7 = vadd.f32 %v2172_v41, %v1271_v1 }
 0x151   : > { %v1459_v9 = vmax.f32 %v1441_v2, 0.0  ;;  %v1439_v51 = vmax.f32 %v1403_v31, %v1421_v5  ;;  %v1424_v8 = vmax.f32 %v2389_v33, %v1388_v38  ;;  %v1386_v52 = vadd.f32 %v2172_v41, %v1307_v40 }
 0x152   : > { %1545 = vst.msk [vmem:[%s2332_s21 + $0x2c] sm:$0xf] %vm1533_vm3, %v1729_v21  ;;  %v1404_v30 = vmax.f32 %v2316_v13, %v1350_v7 }
 0x153   : > { %v1734_v3 = vpack.c.bf16 %v1459_v9, %v1459_v9  ;;  %v1457_v12 = vmax.f32 %v1439_v51, 0.0  ;;  %v1442_v22 = vmax.f32 %v1406_v54, %v1424_v8  ;;  %v1422_v11 = vmax.f32 %v1368_v6, %v1386_v52 }
 0x155   : > { %1550 = vst.msk [vmem:[%s2332_s21 + $0x40] sm:$0xf] %vm1533_vm3, %v1734_v3  ;;  %v1732_v19 = vpack.c.bf16 %v1457_v12, %v1457_v12  ;;  %v1460_v32 = vmax.f32 %v1442_v22, 0.0  ;;  %v1440_v16 = vmax.f32 %v1404_v30, %v1422_v11 }
 0x157   : > { %1548 = vst.msk [vmem:[%s2332_s21 + $0x38] sm:$0xf] %vm1533_vm3, %v1732_v19  ;;  %v1735_v27 = vpack.c.bf16 %v1460_v32, %v1460_v32  ;;  %v1458_v33 = vmax.f32 %v1440_v16, 0.0 }
 0x159   : > { %1551 = vst.msk [vmem:[%s2332_s21 + $0x44] sm:$0xf] %vm1533_vm3, %v1735_v27  ;;  %v1733_v41 = vpack.c.bf16 %v1458_v33, %v1458_v33 }
 0x15b   : > { %1549 = vst.msk [vmem:[%s2332_s21 + $0x3c] sm:$0xf] %vm1533_vm3, %v1733_v41 }
 0x15c PF: > { %p11_p9 = scmp.ge.s32.totalorder %s1986_s19, 4   ;;  %s2491_s15 = smov %s1937_s16 }
 0x15d   : > { %s2492_s16 = smov %s1995_s22  ;;  %s2493_s17 = smov %s1986_s19 }
 0x15e   :  { %13 = sbr.rel (!%p11_p9) target bundleno = 2 (0x2), region = 112 }

// kernel: net_forward.4
= control target key start
LH: loop header
LB: loop body
LE: loop exit
PB: predicated region body
PF: predicated region fallthrough
CT: control target
= control target key end

     0   :  { %s1689_s15 = smov 0   ;;  %s1691_s16 = smov 0   ;;  %s2005_s0 = inlined_call_operand.vmem [shape: bf16[4,32,800], index: 0, kind: input, shape index: {}]   ;;  %s2006_s1 = inlined_call_operand.vmem [shape: bf16[800,32], index: 1, kind: input, shape index: {}]   ;;  %s2007_s2 = inlined_call_operand.vmem [shape: f32[1,32], index: 2, kind: input, shape index: {}]   ;;  %s2008_s3 = inlined_call_operand.vmem [shape: f32[1,32], index: 3, kind: input, shape index: {}]   ;;  %s2009_s4 = inlined_call_operand.vmem [shape: bf16[32,32], index: 4, kind: output, shape index: {}]  }
   0x1   :  { %s1693_s17 = smov 0  }
   0x2 LB: > { %s1253_s18 = sadd.s32 4294967295, %s1662_s17   ;;  %s1706_s19 = sadd.s32 1, %s1662_s17   ;;  %s1662_s17 = sphi %s1693_s17, %s2012_s17   ;;  %s1658_s16 = sphi %s1691_s16, %s2011_s16   ;;  %s1654_s15 = sphi %s1689_s15, %s2010_s15  }
   0x3   : > { %s18_s20 = ssub.s32 %s1662_s17, %s1706_s19  ;;  %s21_s21 = sadd.s32 1, %s1658_s16 }
   0x4   : > { %p19_p0 = scmp.eq.s32.totalorder %s18_s20, 0  ;;  %p28_p1 = scmp.ne.s32.totalorder %s1658_s16, %s1654_s15 }
   0x5   : > { %p29_p2 = scmp.eq.s32.totalorder %s1662_s17, 0  ;;  %p1256_p4 = scmp.ge.s32.totalorder %s1662_s17, 2 }
   0x6   : > { %s1715_s22 = scalar_select %p19_p0, %s1658_s16, %s21_s21  }
   0x7   : > { %p30_p3 = por %p29_p2, %p28_p1  ;;  %152 = sbr.rel (%p1256_p4) target bundleno = 36 (0x24), region = 28 }
   0xe   : > { %155 = sbr.rel (!%p30_p3) target bundleno = 36 (0x24), region = 32  ;;  %s157_s23 = sand.u32 (%p30_p3), 1, %s1658_s16  }
   0xf   : > { %s1524_s24 = smul.u32 (%p30_p3), 56, %s1662_s17 }
  0x10   : > { %s1523_s25 = smul.u32 (%p30_p3), 224, %s157_s23 }
  0x11   : > { %s1723_s28 = scalar_lea.vmem (%p30_p3), %s2005_s0, %s1524_s24 }
  0x12   : > { %v178_v0 = vld [vmem:[%s1723_s28] sm:$0xff] (%p30_p3)  ;;  %v180_v1 = vld [vmem:[%s1723_s28 + $0x8] sm:$0xff] (%p30_p3)  ;;  %v182_v2 = vld [vmem:[%s1723_s28 + $0x10] sm:$0xff] (%p30_p3)  ;;  %s1728_s29 = scalar_lea.vmem (%p30_p3), [#allocation2], %s1523_s25 }
  0x13   : > { %179 = vst [vmem:[%s1728_s29] sm:$0xff] (%p30_p3), %v178_v0  ;;  %181 = vst [vmem:[%s1728_s29 + $0x8] sm:$0xff] (%p30_p3), %v180_v1  ;;  %v184_v3 = vld [vmem:[%s1723_s28 + $0x1c] sm:$0xff] (%p30_p3)  ;;  %v186_v4 = vld [vmem:[%s1723_s28 + $0x24] sm:$0xff] (%p30_p3) }
  0x14   : > { %183 = vst [vmem:[%s1728_s29 + $0x10] sm:$0xff] (%p30_p3), %v182_v2  ;;  %v188_v5 = vld [vmem:[%s1723_s28 + $0x2c] sm:$0xff] (%p30_p3)  ;;  %185 = vst [vmem:[%s1728_s29 + $0x1c] sm:$0xff] (%p30_p3), %v184_v3  ;;  %v192_v7 = vld [vmem:[%s1723_s28 + $0x78] sm:$0xff] (%p30_p3) }
  0x15   : > { %187 = vst [vmem:[%s1728_s29 + $0x24] sm:$0xff] %v186_v4  ;;  %189 = vst [vmem:[%s1728_s29 + $0x2c] sm:$0xff] %v188_v5  ;;  %v190_v6 = vld [vmem:[%s1723_s28 + $0x70] sm:$0xff]  ;;  %v194_v8 = vld [vmem:[%s1723_s28 + $0x80] sm:$0xff] }
  0x16   : > { %191 = vst [vmem:[%s1728_s29 + $0x38] sm:$0xff] %v190_v6  ;;  %193 = vst [vmem:[%s1728_s29 + $0x40] sm:$0xff] %v192_v7  ;;  %v196_v9 = vld [vmem:[%s1723_s28 + $0x8c] sm:$0xff]  ;;  %v198_v10 = vld [vmem:[%s1723_s28 + $0x94] sm:$0xff] }
  0x17   : > { %195 = vst [vmem:[%s1728_s29 + $0x48] sm:$0xff] %v194_v8  ;;  %v200_v11 = vld [vmem:[%s1723_s28 + $0x9c] sm:$0xff]  ;;  %197 = vst [vmem:[%s1728_s29 + $0x54] sm:$0xff] %v196_v9  ;;  %v204_v13 = vld [vmem:[%s1723_s28 + $0xe8] sm:$0xff] }
  0x18   : > { %199 = vst [vmem:[%s1728_s29 + $0x5c] sm:$0xff] %v198_v10  ;;  %201 = vst [vmem:[%s1728_s29 + $0x64] sm:$0xff] %v200_v11  ;;  %v202_v12 = vld [vmem:[%s1723_s28 + $0xe0] sm:$0xff]  ;;  %v206_v14 = vld [vmem:[%s1723_s28 + $0xf0] sm:$0xff] }
  0x19   : > { %203 = vst [vmem:[%s1728_s29 + $0x70] sm:$0xff] %v202_v12  ;;  %205 = vst [vmem:[%s1728_s29 + $0x78] sm:$0xff] %v204_v13  ;;  %v208_v15 = vld [vmem:[%s1723_s28 + $0xfc] sm:$0xff]  ;;  %v210_v16 = vld [vmem:[%s1723_s28 + $0x104] sm:$0xff] }
  0x1a   : > { %207 = vst [vmem:[%s1728_s29 + $0x80] sm:$0xff] %v206_v14  ;;  %v212_v17 = vld [vmem:[%s1723_s28 + $0x10c] sm:$0xff]  ;;  %209 = vst [vmem:[%s1728_s29 + $0x8c] sm:$0xff] %v208_v15  ;;  %v216_v19 = vld [vmem:[%s1723_s28 + $0x158] sm:$0xff] }
  0x1b   : > { %211 = vst [vmem:[%s1728_s29 + $0x94] sm:$0xff] %v210_v16  ;;  %213 = vst [vmem:[%s1728_s29 + $0x9c] sm:$0xff] %v212_v17  ;;  %v214_v18 = vld [vmem:[%s1723_s28 + $0x150] sm:$0xff]  ;;  %v218_v20 = vld [vmem:[%s1723_s28 + $0x160] sm:$0xff] }
  0x1c   : > { %215 = vst [vmem:[%s1728_s29 + $0xa8] sm:$0xff] %v214_v18  ;;  %217 = vst [vmem:[%s1728_s29 + $0xb0] sm:$0xff] %v216_v19  ;;  %v220_v21 = vld [vmem:[%s1723_s28 + $0x16c] sm:$0xff]  ;;  %v222_v22 = vld [vmem:[%s1723_s28 + $0x174] sm:$0xff] }
  0x1d   : > { %219 = vst [vmem:[%s1728_s29 + $0xb8] sm:$0xff] %v218_v20  ;;  %v224_v23 = vld [vmem:[%s1723_s28 + $0x17c] sm:$0xff]  ;;  %221 = vst [vmem:[%s1728_s29 + $0xc4] sm:$0xff] %v220_v21  ;;  %v1260_v24 = vld [vmem:[%s1723_s28 + $0x18] sm:$0xf] }
  0x1e   : > { %223 = vst [vmem:[%s1728_s29 + $0xcc] sm:$0xff] %v222_v22  ;;  %225 = vst [vmem:[%s1728_s29 + $0xd4] sm:$0xff] %v224_v23  ;;  %v1262_v25 = vld [vmem:[%s1723_s28 + $0x34] sm:$0xf]  ;;  %v1264_v26 = vld [vmem:[%s1723_s28 + $0x88] sm:$0xf] }
  0x1f   : > { %1261 = vst [vmem:[%s1728_s29 + $0x18] sm:$0xf] %v1260_v24  ;;  %1263 = vst [vmem:[%s1728_s29 + $0x34] sm:$0xf] %v1262_v25  ;;  %v1266_v27 = vld [vmem:[%s1723_s28 + $0xa4] sm:$0xf] }
  0x20   : > { %1265 = vst [vmem:[%s1728_s29 + $0x50] sm:$0xf] %v1264_v26  ;;  %v1268_v28 = vld [vmem:[%s1723_s28 + $0xf8] sm:$0xf]  ;;  %v1270_v29 = vld [vmem:[%s1723_s28 + $0x114] sm:$0xf] }
  0x21   : > { %1267 = vst [vmem:[%s1728_s29 + $0x6c] sm:$0xf] %v1266_v27  ;;  %1269 = vst [vmem:[%s1728_s29 + $0x88] sm:$0xf] %v1268_v28  ;;  %v1272_v30 = vld [vmem:[%s1723_s28 + $0x168] sm:$0xf] }
  0x22   : > { %1271 = vst [vmem:[%s1728_s29 + $0xa4] sm:$0xf] %v1270_v29  ;;  %v1274_v31 = vld [vmem:[%s1723_s28 + $0x184] sm:$0xf]  ;;  %1273 = vst [vmem:[%s1728_s29 + $0xc0] sm:$0xf] %v1272_v30 }
  0x23   : > { %1275 = vst [vmem:[%s1728_s29 + $0xdc] sm:$0xf] %v1274_v31 }
  0x24 PF: > { %p1276_p5 = scmp.ge.s32.totalorder %s1662_s17, 1  ;;  %p253_p6 = scmp.lt.s32.totalorder %s1662_s17, 3 }
  0x26   : > { %p254_p7 = pnand %p1276_p5, %p253_p6 }
  0x27   : > { %v1550_v32 = vld [vmem:[%s2006_s1 + $0x40] sm:$0xff] (!%p254_p7)   ;;  %v1554_v36 = vld [vmem:[%s2006_s1 + $0x48] sm:$0xff] (!%p254_p7)   ;;  %v1558_v40 = vld [vmem:[%s2006_s1 + $0x50] sm:$0xff] (!%p254_p7)   ;;  %s260_s10 = sand.u32 (!%p254_p7), 1, %s1654_s15   ;;  %vm865_vm0 = vcmask (!%p254_p7), 261120   ;;  %s1277_s8 = sshll.u32 (!%p254_p7), %s1253_s18, 1 }
  0x28   : > { %257 = sbr.rel (%p254_p7) target bundleno = 356 (0x164), region = 58  ;;  %v1551_v33 = vld [vmem:[%s2006_s1 + $0xc0] sm:$0xff] (!%p254_p7)   ;;  %1369 = vmatprep.subr.bf16.mxu0 (!%p254_p7), %v1550_v32  ;;  %v1555_v37 = vld [vmem:[%s2006_s1 + $0xc8] sm:$0xff] (!%p254_p7)   ;;  %v1559_v41 = vld [vmem:[%s2006_s1 + $0xd0] sm:$0xff] (!%p254_p7)   ;;  %p287_p8 = scmp.lt.s32.totalorder (!%p254_p7), %s1277_s8, 3  ;;  %vm1184_vm1 = vcmask (!%p254_p7), 257024  }
  0x29   : > { %v1552_v34 = vld [vmem:[%s2006_s1] sm:$0xff] (!%p254_p7)   ;;  %1409 = vmatprep.subr.bf16.mxu1 (!%p254_p7), %v1551_v33  ;;  %v1556_v38 = vld [vmem:[%s2006_s1 + $0x8] sm:$0xff] (!%p254_p7)   ;;  %v1560_v42 = vld [vmem:[%s2006_s1 + $0x10] sm:$0xff] (!%p254_p7)   ;;  %s1525_s23 = smul.u32 (!%p254_p7), 224, %s260_s10 }
  0x2a   : > { %v1553_v35 = vld [vmem:[%s2006_s1 + $0x80] sm:$0xff] (!%p254_p7)   ;;  %1370 = vmatpush3.bf16.msra.mxu0 (!%p254_p7), %v1552_v34  ;;  %v1557_v39 = vld [vmem:[%s2006_s1 + $0x88] sm:$0xff] (!%p254_p7)   ;;  %v1561_v43 = vld [vmem:[%s2006_s1 + $0x90] sm:$0xff] (!%p254_p7)  }
  0x2b   : > { %1410 = vmatpush3.bf16.msra.mxu1 (!%p254_p7), %v1553_v35  ;;  %1371 = vmatprep.subr.bf16.mxu0 (!%p254_p7), %v1554_v36  ;;  %v1562_v44 = vld [vmem:[%s2006_s1 + $0x58] sm:$0xff] (!%p254_p7)   ;;  %v1566_v48 = vld [vmem:[%s2006_s1 + $0x60] sm:$0xff] (!%p254_p7)   ;;  %v1570_v52 = vld [vmem:[%s2006_s1 + $0x68] sm:$0xff] (!%p254_p7)   ;;  %s1890_s9 = scalar_lea.vmem (!%p254_p7), [#allocation2], %s1525_s23 }
  0x2c   : > { %1411 = vmatprep.subr.bf16.mxu1 (!%p254_p7), %v1555_v37  ;;  %v1563_v45 = vld [vmem:[%s2006_s1 + $0xd8] sm:$0xff] (!%p254_p7)   ;;  %v1567_v49 = vld [vmem:[%s2006_s1 + $0xe0] sm:$0xff] (!%p254_p7)   ;;  %v1571_v53 = vld [vmem:[%s2006_s1 + $0xe8] sm:$0xff] (!%p254_p7)  }
  0x2d   : > { %v1564_v46 = vld [vmem:[%s2006_s1 + $0x18] sm:$0xff] (!%p254_p7)   ;;  %v1568_v50 = vld [vmem:[%s2006_s1 + $0x20] sm:$0xff] (!%p254_p7)   ;;  %v1572_v54 = vld [vmem:[%s2006_s1 + $0x28] sm:$0xff] (!%p254_p7)  }
  0x2e   : > { %1372 = vmatpush3.bf16.msra.mxu0 (!%p254_p7), %v1556_v38  ;;  %v1565_v47 = vld [vmem:[%s2006_s1 + $0x98] sm:$0xff] (!%p254_p7)   ;;  %v1569_v51 = vld [vmem:[%s2006_s1 + $0xa0] sm:$0xff] (!%p254_p7)   ;;  %v1573_v55 = vld [vmem:[%s2006_s1 + $0xa8] sm:$0xff] (!%p254_p7)  }
  0x2f   : > { %1412 = vmatpush3.bf16.msra.mxu1 %v1557_v39  ;;  %1373 = vmatprep.subr.bf16.mxu0 %v1558_v40  ;;  %v1574_v56 = vld [vmem:[%s2006_s1 + $0x70] sm:$0xff]   ;;  %v1578_v60 = vld [vmem:[%s2006_s1 + $0x78] sm:$0xff]   ;;  %v1584_v1 = vld [vmem:[%s1890_s9 + $0x4] ss:$28 sps:$4 sm:$0xff]   ;;  %s2014_s8 = smov (!%p287_p8, %s1277_s8), 3 }
  0x30   : > { %1413 = vmatprep.subr.bf16.mxu1 %v1559_v41  ;;  %v1575_v57 = vld [vmem:[%s2006_s1 + $0xf0] sm:$0xff]   ;;  %v1579_v61 = vld [vmem:[%s2006_s1 + $0xf8] sm:$0xff]   ;;  %v1585_v2 = vld [vmem:[%s1890_s9 + $0x8] ss:$28 sps:$4 sm:$0xff]   ;;  %910 = vmatprep.mubr.bf16.mxu0 %v1584_v1  ;;  %s1278_s17 = sshll.u32 %s2014_s8, 2 }
  0x31   : > { %v1576_v58 = vld [vmem:[%s2006_s1 + $0x30] sm:$0xff]   ;;  %v1580_v62 = vld [vmem:[%s2006_s1 + $0x38] sm:$0xff]   ;;  %v1587_v3 = vld [vmem:[%s1890_s9 + $0xc] ss:$28 sps:$4 sm:$0xff]   ;;  %s290_s11 = scalar_lea.vmem %s2009_s4, %s1278_s17 }
  0x32   : > { %1374 = vmatpush3.bf16.msra.mxu0 %v1560_v42  ;;  %v1577_v59 = vld [vmem:[%s2006_s1 + $0xb0] sm:$0xff]   ;;  %v1581_v63 = vld [vmem:[%s2006_s1 + $0xb8] sm:$0xff]   ;;  %v1588_v4 = vld [vmem:[%s2006_s1 + $0x140] sm:$0xff]   ;;  %975 = vmatprep.mubr.bf16.mxu1 %v1587_v3 }
  0x33   : > { %1414 = vmatpush3.bf16.msra.mxu1 %v1561_v43  ;;  %1375 = vmatprep.subr.bf16.mxu0 %v1562_v44  ;;  %v1582_v0 = vld [vmem:[%s1890_s9] ss:$28 sps:$4 sm:$0xff]   ;;  %v1590_v6 = vld [vmem:[%s2006_s1 + $0x148] sm:$0xff]   ;;  %v1596_v10 = vld [vmem:[%s1890_s9 + $0x38] ss:$28 sps:$4 sm:$0xff]  }
  0x34   : > { %1415 = vmatprep.subr.bf16.mxu1 %v1563_v45  ;;  %v1589_v5 = vld [vmem:[%s2006_s1 + $0x100] sm:$0xff]   ;;  %v1591_v7 = vld [vmem:[%s2006_s1 + $0x108] sm:$0xff]   ;;  %v1592_v8 = vld [vmem:[%s1890_s9 + $0x3c] ss:$28 sps:$4 sm:$0xff]  }
  0x35   : > { %v1594_v9 = vld [vmem:[%s1890_s9 + $0x44] ss:$28 sps:$4 sm:$0xff]   ;;  %v1598_v12 = vld [vmem:[%s2006_s1 + $0x150] sm:$0xff]   ;;  %v1600_v14 = vld [vmem:[%s2006_s1 + $0x158] sm:$0xff]  }
  0x36   : > { %1376 = vmatpush3.bf16.msra.mxu0 %v1564_v46  ;;  %v1597_v11 = vld [vmem:[%s1890_s9 + $0x40] ss:$28 sps:$4 sm:$0xff]   ;;  %v1599_v13 = vld [vmem:[%s2006_s1 + $0x110] sm:$0xff]   ;;  %v1610_v22 = vld [vmem:[%s2006_s1 + $0x168] sm:$0xff]  }
  0x37   : > { %1416 = vmatpush3.bf16.msra.mxu1 %v1565_v47  ;;  %1377 = vmatprep.subr.bf16.mxu0 %v1566_v48  ;;  %v1601_v15 = vld [vmem:[%s2006_s1 + $0x118] sm:$0xff]   ;;  %v1602_v16 = vld [vmem:[%s1890_s9 + $0x74] ss:$28 sps:$4 sm:$0xff]   ;;  %v1608_v19 = vld [vmem:[%s2006_s1 + $0x160] sm:$0xff]  }
  0x38   : > { %1417 = vmatprep.subr.bf16.mxu1 %v1567_v49  ;;  %v1604_v17 = vld [vmem:[%s1890_s9 + $0x7c] ss:$28 sps:$4 sm:$0xff]   ;;  %v1606_v18 = vld [vmem:[%s1890_s9 + $0x70] ss:$28 sps:$4 sm:$0xff]   ;;  %v1609_v21 = vld [vmem:[%s2006_s1 + $0x120] sm:$0xff]  }
  0x39   : > { %v1607_v20 = vld [vmem:[%s1890_s9 + $0x78] ss:$28 sps:$4 sm:$0xff]   ;;  %v1612_v23 = vld [vmem:[%s1890_s9 + $0xac] ss:$28 sps:$4 sm:$0xff]   ;;  %v1628_v34 = vld [vmem:[%s2006_s1 + $0x180] sm:$0xff]  }
  0x3a   : > { %1378 = vmatpush3.bf16.msra.mxu0 %v1568_v50  ;;  %v1614_v24 = vld [vmem:[%s1890_s9 + $0xb4] ss:$28 sps:$4 sm:$0xff]   ;;  %v1611_v25 = vld [vmem:[%s2006_s1 + $0x128] sm:$0xff]   ;;  %v1620_v30 = vld [vmem:[%s2006_s1 + $0x178] sm:$0xff]  }
  0x3b   : > { %1418 = vmatpush3.bf16.msra.mxu1 %v1569_v51  ;;  %1379 = vmatprep.subr.bf16.mxu0 %v1570_v52  ;;  %v1618_v26 = vld [vmem:[%s2006_s1 + $0x170] sm:$0xff]   ;;  %v1616_v27 = vld [vmem:[%s1890_s9 + $0xa8] ss:$28 sps:$4 sm:$0xff]   ;;  %v1627_v32 = vld [vmem:[%s1890_s9 + $0xbc] ss:$28 sps:$4 sm:$0xff]  }
  0x3c   : > { %1419 = vmatprep.subr.bf16.mxu1 %v1571_v53  ;;  %v1617_v28 = vld [vmem:[%s1890_s9 + $0xb0] ss:$28 sps:$4 sm:$0xff]   ;;  %v1621_v33 = vld [vmem:[%s2006_s1 + $0x138] sm:$0xff]   ;;  %v1633_v40 = vld [vmem:[%s1890_s9 + $0x48] ss:$28 sps:$4 sm:$0xff]  }
  0x3d   : > { %v1619_v29 = vld [vmem:[%s2006_s1 + $0x130] sm:$0xff]   ;;  %v1630_v37 = vld [vmem:[%s1890_s9 + $0x4c] ss:$28 sps:$4 sm:$0xff]   ;;  %v1635_v42 = vld [vmem:[%s1890_s9 + $0x84] ss:$28 sps:$4 sm:$0xff]  }
  0x3e   : > { %1380 = vmatpush3.bf16.msra.mxu0 %v1572_v54  ;;  %v1624_v31 = vld [vmem:[%s1890_s9 + $0x14] ss:$28 sps:$4 sm:$0xff]   ;;  %v1629_v39 = vld [vmem:[%s2006_s1 + $0x188] sm:$0xff]   ;;  %v1638_v44 = vld [vmem:[%s1890_s9 + $0x80] ss:$28 sps:$4 sm:$0xff]  }
  0x3f   : > { %1420 = vmatpush3.bf16.msra.mxu1 %v1573_v55  ;;  %1381 = vmatprep.subr.bf16.mxu0 %v1574_v56  ;;  %v1622_v35 = vld [vmem:[%s1890_s9 + $0x10] ss:$28 sps:$4 sm:$0xff]   ;;  %v1625_v36 = vld [vmem:[%s1890_s9 + $0xb8] ss:$28 sps:$4 sm:$0xff]   ;;  %v1637_v43 = vld [vmem:[%s1890_s9 + $0x88] ss:$28 sps:$4 sm:$0xff]  }
  0x40   : > { %1421 = vmatprep.subr.bf16.mxu1 %v1575_v57  ;;  %v1632_v38 = vld [vmem:[%s1890_s9 + $0x18] ss:$28 sps:$4 sm:$0xff]   ;;  %v1634_v41 = vld [vmem:[%s1890_s9 + $0x50] ss:$28 sps:$4 sm:$0xff]   ;;  %v1639_v45 = vld [vmem:[%s1890_s9 + $0xc0] ss:$28 sps:$4 sm:$0xff]  }
  0x42   : > { %1382 = vmatpush3.bf16.msra.mxu0 %v1576_v58 }
  0x43   : > { %1422 = vmatpush3.bf16.msra.mxu1 %v1577_v59  ;;  %1383 = vmatprep.subr.bf16.mxu0 %v1578_v60 }
  0x44   : > { %1423 = vmatprep.subr.bf16.mxu1 %v1579_v61 }
  0x46   : > { %1384 = vmatpush3.bf16.msra.mxu0 %v1580_v62 }
  0x47   : > { %1424 = vmatpush3.bf16.msra.mxu1 %v1581_v63  ;;  %1449 = vmatprep.subr.bf16.mxu0 %v1588_v4 }
  0x48   : > { %1507 = vmatprep.subr.bf16.mxu1 %v1588_v4 }
  0x49   : > { %911 = vmatmul.mubr.bf16.vlgmr.msra.gmra.mrb[0].mxu0 %v1582_v0 }
  0x4a   : > { %976 = vmatmul.mubr.bf16.vlgmr.msra.gmra.mrb[0].mxu1 %v1585_v2  ;;  %1450 = vmatpush3.bf16.msra.mxu0 %v1589_v5 }
  0x4b   : > { %1515 = vmatpush3.bf16.msra.mxu1 %v1589_v5  ;;  %1451 = vmatprep.subr.bf16.mxu0 %v1590_v6 }
  0x4c   : > { %1508 = vmatprep.subr.bf16.mxu1 %v1590_v6  ;;  %918 = vmatprep.mubr.bf16.mxu0 %v1592_v8 }
  0x4d   : > { %983 = vmatprep.mubr.bf16.mxu1 %v1594_v9 }
  0x4e   : > { %1452 = vmatpush3.bf16.msra.mxu0 %v1591_v7 }
  0x4f   : > { %1516 = vmatpush3.bf16.msra.mxu1 %v1591_v7  ;;  %1453 = vmatprep.subr.bf16.mxu0 %v1598_v12 }
  0x50   : > { %1509 = vmatprep.subr.bf16.mxu1 %v1598_v12 }
  0x51   : > { %919 = vmatmul.mubr.bf16.gmra.mrb[4].mxu0 %v1596_v10 }
  0x52   : > { %984 = vmatmul.mubr.bf16.gmra.mrb[4].mxu1 %v1597_v11  ;;  %1454 = vmatpush3.bf16.msra.mxu0 %v1599_v13 }
  0x53   : > { %1517 = vmatpush3.bf16.msra.mxu1 %v1599_v13  ;;  %1455 = vmatprep.subr.bf16.mxu0 %v1600_v14 }
  0x54   : > { %1510 = vmatprep.subr.bf16.mxu1 %v1600_v14  ;;  %926 = vmatprep.mubr.bf16.mxu0 %v1602_v16 }
  0x55   : > { %991 = vmatprep.mubr.bf16.mxu1 %v1604_v17 }
  0x56   : > { %1456 = vmatpush3.bf16.msra.mxu0 %v1601_v15 }
  0x57   : > { %1518 = vmatpush3.bf16.msra.mxu1 %v1601_v15  ;;  %1457 = vmatprep.subr.bf16.mxu0 %v1608_v19 }
  0x58   : > { %1511 = vmatprep.subr.bf16.mxu1 %v1608_v19 }
  0x59   : > { %927 = vmatmul.mubr.bf16.gmra.mrb[8].mxu0 %v1606_v18 }
  0x5a   : > { %992 = vmatmul.mubr.bf16.gmra.mrb[8].mxu1 %v1607_v20  ;;  %1458 = vmatpush3.bf16.msra.mxu0 %v1609_v21 }
  0x5b   : > { %934 = vmatprep.mubr.bf16.mxu0 %v1612_v23  ;;  %1519 = vmatpush3.bf16.msra.mxu1 %v1609_v21 }
  0x5c   : > { %1459 = vmatprep.subr.bf16.mxu0 %v1610_v22  ;;  %1512 = vmatprep.subr.bf16.mxu1 %v1610_v22 }
  0x5d   : > { %999 = vmatprep.mubr.bf16.mxu1 %v1614_v24 }
  0x5e   : > { %1460 = vmatpush3.bf16.msra.mxu0 %v1611_v25 }
  0x5f   : > { %1520 = vmatpush3.bf16.msra.mxu1 %v1611_v25  ;;  %1461 = vmatprep.subr.bf16.mxu0 %v1618_v26 }
  0x60   : > { %1513 = vmatprep.subr.bf16.mxu1 %v1618_v26 }
  0x61   : > { %935 = vmatmul.mubr.bf16.gmra.mrb[12].mxu0 %v1616_v27 }
  0x62   : > { %1000 = vmatmul.mubr.bf16.gmra.mrb[12].mxu1 %v1617_v28  ;;  %1040 = vmatprep.mubr.bf16.mxu0 %v1624_v31 }
  0x63   : > { %1462 = vmatpush3.bf16.msra.mxu0 %v1619_v29  ;;  %1521 = vmatpush3.bf16.msra.mxu1 %v1619_v29 }
  0x64   : > { %1463 = vmatprep.subr.bf16.mxu0 %v1620_v30  ;;  %1514 = vmatprep.subr.bf16.mxu1 %v1620_v30 }
  0x65   : > { %1064 = vmatprep.mubr.bf16.mxu1 %v1627_v32 }
  0x67   : > { %1464 = vmatpush3.bf16.msra.mxu0 %v1621_v33  ;;  %1522 = vmatpush3.bf16.msra.mxu1 %v1621_v33 }
  0x68   : > { %1495 = vmatprep.subr.bf16.mxu1 %v1628_v34 }
  0x6a   : > { %1041 = vmatmul.mubr.bf16.vlgmr.msra.gmra.mrb[16].mxu0 %v1622_v35  ;;  %1065 = vmatmul.mubr.bf16.vlgmr.msra.gmra.mrb[16].mxu1 %v1625_v36 }
  0x6b   : > { %1048 = vmatprep.mubr.bf16.mxu0 %v1630_v37  ;;  %1496 = vmatpush3.bf16.msra.mxu1 %v1628_v34 }
  0x6c   : > { %1499 = vmatprep.mubr.msk.bf16.mxu1 %vm865_vm0, %v1632_v38  ;;  %1497 = vmatprep.subr.bf16.mxu1 %v1629_v39 }
  0x6f   : > { %1498 = vmatpush3.bf16.msra.mxu1 %v1629_v39 }
  0x72   : > { %1049 = vmatmul.mubr.bf16.gmra.mrb[20].mxu0 %v1633_v40  ;;  %1500 = vmatmul.mubr.msk.bf16.vlgmr.msra.gmra.mrb[20].mxu1 %vm865_vm0, %v1634_v41 }
  0x73   : > { %1056 = vmatprep.mubr.bf16.mxu0 %v1635_v42  ;;  %1503 = vmatprep.mubr.msk.bf16.mxu1 %vm865_vm0, %v1637_v43 }
  0x7a   : > { %1057 = vmatmul.mubr.bf16.gmra.mrb[24].mxu0 %v1638_v44  ;;  %1504 = vmatmul.mubr.msk.bf16.gmra.mrb[24].mxu1 %vm865_vm0, %v1639_v45 }
 0x11c   : > { %v1385_v46 = vpop.f32.mrb[0].mxu0 }
 0x11d   : > { %v1425_v47 = vpop.f32.mrb[0].mxu1  ;;  %v1386_v48 = vpop.f32.mrb[1].mxu0 }
 0x11e   : > { %v1387_v49 = vadd.f32 %v1386_v48, %v1385_v46  ;;  %v1426_v50 = vpop.f32.mrb[1].mxu1  ;;  %v1388_v51 = vpop.f32.mrb[2].mxu0 }
 0x11f   : > { %v1427_v52 = vadd.f32 %v1426_v50, %v1425_v47  ;;  %v1428_v53 = vpop.f32.mrb[2].mxu1  ;;  %v1389_v54 = vpop.f32.mrb[3].mxu0 }
 0x120   : > { %v1390_v55 = vadd.f32 %v1389_v54, %v1388_v51  ;;  %v1429_v56 = vpop.f32.mrb[3].mxu1 }
 0x121   : > { %v978_v57 = vadd.f32 %v1427_v52, %v1387_v49  ;;  %v1430_v58 = vadd.f32 %v1429_v56, %v1428_v53 }
 0x123   : > { %v981_v59 = vadd.f32 %v1430_v58, %v1390_v55 }
 0x124   : > { %v1391_v60 = vpop.f32.mrb[4].mxu0 }
 0x125   : > { %v1431_v61 = vpop.f32.mrb[4].mxu1  ;;  %v1392_v62 = vpop.f32.mrb[5].mxu0 }
 0x126   : > { %v1393_v63 = vadd.f32 %v1392_v62, %v1391_v60  ;;  %v1432_v0 = vpop.f32.mrb[5].mxu1  ;;  %v1394_v1 = vpop.f32.mrb[6].mxu0  ;;  %v1361_v60 = vld [vmem:[%s2007_s2] ss:$0 sm:$0xff] }
 0x127   : > { %v1433_v2 = vadd.f32 %v1432_v0, %v1431_v61  ;;  %v1434_v3 = vpop.f32.mrb[6].mxu1  ;;  %v1395_v4 = vpop.f32.mrb[7].mxu0 }
 0x128   : > { %v1396_v5 = vadd.f32 %v1395_v4, %v1394_v1  ;;  %v1435_v6 = vpop.f32.mrb[7].mxu1 }
 0x129   : > { %v986_v7 = vadd.f32 %v1433_v2, %v1393_v63  ;;  %v1436_v8 = vadd.f32 %v1435_v6, %v1434_v3  ;;  %v1362_v6 = vld [vmem:[%s2008_s3] ss:$0 sm:$0xff] }
 0x12b   : > { %v989_v9 = vadd.f32 %v1436_v8, %v1396_v5 }
 0x12c   : > { %v1397_v10 = vpop.f32.mrb[8].mxu0 }
 0x12d   : > { %v1437_v11 = vpop.f32.mrb[8].mxu1  ;;  %v1398_v12 = vpop.f32.mrb[9].mxu0 }
 0x12e   : > { %v1399_v13 = vadd.f32 %v1398_v12, %v1397_v10  ;;  %v1438_v14 = vpop.f32.mrb[9].mxu1  ;;  %v1400_v15 = vpop.f32.mrb[10].mxu0 }
 0x12f   : > { %v1439_v16 = vadd.f32 %v1438_v14, %v1437_v11  ;;  %v1440_v17 = vpop.f32.mrb[10].mxu1  ;;  %v1401_v18 = vpop.f32.mrb[11].mxu0 }
 0x130   : > { %v1402_v19 = vadd.f32 %v1401_v18, %v1400_v15  ;;  %v1441_v20 = vpop.f32.mrb[11].mxu1 }
 0x131   : > { %v1978_v21 = vadd.f32 %v1439_v16, %v1399_v13  ;;  %v1442_v22 = vadd.f32 %v1441_v20, %v1440_v17 }
 0x133   : > { %v1980_v23 = vadd.f32 %v1442_v22, %v1402_v19 }
 0x134   : > { %v1403_v24 = vpop.f32.mrb[12].mxu0 }
 0x135   : > { %v1443_v25 = vpop.f32.mrb[12].mxu1  ;;  %v1404_v26 = vpop.f32.mrb[13].mxu0 }
 0x136   : > { %v1405_v27 = vadd.f32 %v1404_v26, %v1403_v24  ;;  %v1444_v28 = vpop.f32.mrb[13].mxu1  ;;  %v1406_v29 = vpop.f32.mrb[14].mxu0 }
 0x137   : > { %v1445_v30 = vadd.f32 %v1444_v28, %v1443_v25  ;;  %v1446_v31 = vpop.f32.mrb[14].mxu1  ;;  %v1407_v32 = vpop.f32.mrb[15].mxu0 }
 0x138   : > { %v1408_v33 = vadd.f32 %v1407_v32, %v1406_v29  ;;  %v1447_v34 = vpop.f32.mrb[15].mxu1 }
 0x139   : > { %v1002_v35 = vadd.f32 %v1445_v30, %v1405_v27  ;;  %v1448_v36 = vadd.f32 %v1447_v34, %v1446_v31 }
 0x13b   : > { %v1005_v37 = vadd.f32 %v1448_v36, %v1408_v33 }
 0x13d   : > { %v1465_v38 = vpop.f32.mrb[16].mxu0  ;;  %v1483_v39 = vpop.f32.mrb[16].mxu1 }
 0x13e   : > { %v1466_v40 = vpop.f32.mrb[17].mxu0  ;;  %v1484_v42 = vpop.f32.mrb[17].mxu1 }
 0x13f   : > { %v1467_v41 = vadd.f32 %v1466_v40, %v1465_v38  ;;  %v1468_v43 = vpop.f32.mrb[18].mxu0  ;;  %v1485_v44 = vadd.f32 %v1484_v42, %v1483_v39  ;;  %v1486_v45 = vpop.f32.mrb[18].mxu1 }
 0x140   : > { %v1469_v46 = vpop.f32.mrb[19].mxu0  ;;  %v1487_v48 = vpop.f32.mrb[19].mxu1 }
 0x141   : > { %v1470_v47 = vadd.f32 %v1469_v46, %v1468_v43  ;;  %v1043_v49 = vadd.f32 %v1467_v41, %v978_v57  ;;  %v1488_v50 = vadd.f32 %v1487_v48, %v1486_v45  ;;  %v1067_v51 = vadd.f32 %v1485_v44, %v1002_v35 }
 0x143   : > { %v1046_v52 = vadd.f32 %v1470_v47, %v981_v59  ;;  %v1070_v53 = vadd.f32 %v1488_v50, %v1005_v37 }
 0x145   : > { %v1471_v54 = vpop.f32.mrb[20].mxu0  ;;  %v1501_v55 = vpop.f32.mrb[20].mxu1 }
 0x146   : > { %v1472_v56 = vpop.f32.mrb[21].mxu0  ;;  %v1107_v61 = vpop.f32.mrb[21].mxu1 }
 0x147   : > { %v1473_v58 = vadd.f32 %v1472_v56, %v1471_v54  ;;  %v1474_v62 = vpop.f32.mrb[22].mxu0  ;;  %v1108_v63 = vadd.f32 %v1107_v61, %v1043_v49  ;;  %v1502_v0 = vpop.f32.mrb[22].mxu1 }
 0x148   : > { %v1475_v1 = vpop.f32.mrb[23].mxu0  ;;  %v1110_v57 = vpop.f32.mrb[23].mxu1 }
 0x149   : > { %v1051_v2 = vadd.f32 %v1473_v58, %v986_v7  ;;  %v1476_v3 = vadd.f32 %v1475_v1, %v1474_v62  ;;  %v1145_v4 = vmul.f32 %v1361_v60, %v1108_v63  ;;  %v1111_v5 = vadd.f32 %v1110_v57, %v1046_v52 }
 0x14b   : > { %v1116_v59 = vadd.f32 %v1501_v55, %v1051_v2  ;;  %v1054_v8 = vadd.f32 %v1476_v3, %v989_v9  ;;  %v1146_v12 = vmul.f32 %v1361_v60, %v1111_v5  ;;  %v1160_v14 = vadd.f32 %v1362_v6, %v1145_v4 }
 0x14d   : > { %v1147_v10 = vmul.f32 %v1361_v60, %v1116_v59  ;;  %v1119_v11 = vadd.f32 %v1502_v0, %v1054_v8  ;;  %v1477_v13 = vpop.f32.mrb[24].mxu0  ;;  %v1505_v15 = vpop.f32.mrb[24].mxu1  ;;  %v1161_v27 = vadd.f32 %v1362_v6, %v1146_v12 }
 0x14e   : > { %v1478_v16 = vpop.f32.mrb[25].mxu0  ;;  %v1132_v18 = vadd.f32 %v1505_v15, %v1067_v51  ;;  %v1123_v20 = vpop.f32.mrb[25].mxu1 }
 0x14f   : > { %v1162_v17 = vadd.f32 %v1362_v6, %v1147_v10  ;;  %v1148_v7 = vmul.f32 %v1361_v60, %v1119_v11  ;;  %v1479_v19 = vadd.f32 %v1478_v16, %v1477_v13  ;;  %v1480_v22 = vpop.f32.mrb[26].mxu0  ;;  %v1506_v24 = vpop.f32.mrb[26].mxu1 }
 0x150   : > { %v1481_v25 = vpop.f32.mrb[27].mxu0  ;;  %v1126_v29 = vpop.f32.mrb[27].mxu1  ;;  %v1135_v30 = vadd.f32 %v1506_v24, %v1070_v53  ;;  %v1151_v33 = vmul.f32 %v1361_v60, %v1132_v18 }
 0x151   : > { %v1168_v26 = vmax.f32 %v1160_v14, %v1162_v17  ;;  %v1163_v9 = vadd.f32 %v1362_v6, %v1148_v7  ;;  %v1059_v28 = vadd.f32 %v1479_v19, %v1978_v21  ;;  %v1482_v31 = vadd.f32 %v1481_v25, %v1480_v22 }
 0x152   : > { %v1152_v37 = vmul.f32 %v1361_v60, %v1135_v30  ;;  %v1166_v39 = vadd.f32 %v1362_v6, %v1151_v33 }
 0x153   : > { %v1169_v32 = vmax.f32 %v1161_v27, %v1163_v9  ;;  %v1124_v34 = vadd.f32 %v1123_v20, %v1059_v28  ;;  %v1062_v35 = vadd.f32 %v1482_v31, %v1980_v23 }
 0x154   : > { %v1167_v43 = vadd.f32 %v1362_v6, %v1152_v37 }
 0x155   : > { %v1149_v36 = vmul.f32 %v1361_v60, %v1124_v34  ;;  %v1127_v38 = vadd.f32 %v1126_v29, %v1062_v35 }
 0x157   : > { %v1164_v40 = vadd.f32 %v1362_v6, %v1149_v36  ;;  %v1150_v41 = vmul.f32 %v1361_v60, %v1127_v38 }
 0x159   : > { %v1170_v42 = vmax.f32 %v1164_v40, %v1166_v39  ;;  %v1165_v44 = vadd.f32 %v1362_v6, %v1150_v41 }
 0x15b   : > { %v1172_v21 = vmax.f32 %v1168_v26, %v1170_v42  ;;  %v1171_v45 = vmax.f32 %v1165_v44, %v1167_v43 }
 0x15d   : > { %v1174_v46 = vmax.f32 %v1172_v21, 0.0  ;;  %v1173_v23 = vmax.f32 %v1169_v32, %v1171_v45 }
 0x15f   : > { %v1367_v47 = vpack.c.bf16 %v1174_v46, %v1174_v46  ;;  %v1175_v48 = vmax.f32 %v1173_v23, 0.0 }
 0x161   : > { %1185 = vst.msk [vmem:[%s290_s11] sm:$0xf] %vm1184_vm1, %v1367_v47  ;;  %v1368_v49 = vpack.c.bf16 %v1175_v48, %v1175_v48 }
 0x163   : > { %1186 = vst.msk [vmem:[%s290_s11 + $0x4] sm:$0xf] %vm1184_vm1, %v1368_v49 }
 0x164 PF: > { %p11_p9 = scmp.ge.s32.totalorder %s1706_s19, 4   ;;  %s2010_s15 = smov %s1658_s16 }
 0x165   : > { %s2011_s16 = smov %s1715_s22  ;;  %s2012_s17 = smov %s1706_s19 }
 0x166   :  { %13 = sbr.rel (!%p11_p9) target bundleno = 2 (0x2), region = 103 }

// kernel: net_forward.5
= control target key start
LH: loop header
LB: loop body
LE: loop exit
PB: predicated region body
PF: predicated region fallthrough
CT: control target
= control target key end

     0   :  { %v89_v38 = vlaneseq  ;;  %v986_v39 = vmov 1966171168   ;;  %s1284_s0 = inlined_call_operand.vmem [shape: bf16[2,512], index: 0, kind: input, shape index: {}]   ;;  %s1285_s1 = inlined_call_operand.vmem [shape: bf16[512,256], index: 1, kind: input, shape index: {}]   ;;  %s1286_s2 = inlined_call_operand.vmem [shape: f32[1,256], index: 2, kind: input, shape index: {}]   ;;  %s1287_s3 = inlined_call_operand.vmem [shape: bf16[256,128], index: 3, kind: input, shape index: {}]   ;;  %s1288_s4 = inlined_call_operand.vmem [shape: f32[1,128], index: 4, kind: input, shape index: {}]   ;;  %s1289_s5 = inlined_call_operand.hbm [shape: f32[2,128], index: 5, kind: output, shape index: {}]  }
   0x1   :  { %v846_v0 = vld [vmem:[%s1285_s1 + $0x4] ss:$8 sps:$4 sm:$0xff]   ;;  %v850_v2 = vld [vmem:[%s1285_s1] ss:$8 sps:$4 sm:$0xff]   ;;  %v852_v4 = vld [vmem:[%s1285_s1 + $0x14] ss:$8 sps:$4 sm:$0xff]   ;;  %v109_v40 = vunpack.c.l.s4 %v986_v39 }
   0x2   :  { %v848_v1 = vld [vmem:[%s1285_s1 + $0x104] ss:$8 sps:$4 sm:$0xff]   ;;  %448 = vmatprep.subr.bf16.mxu1 %v846_v0  ;;  %v851_v3 = vld [vmem:[%s1285_s1 + $0x100] ss:$8 sps:$4 sm:$0xff]   ;;  %v854_v5 = vld [vmem:[%s1285_s1 + $0x114] ss:$8 sps:$4 sm:$0xff]  }
   0x3   :  { %489 = vmatprep.subr.bf16.mxu0 %v848_v1  ;;  %449 = vmatpush1.bf16.msra.mxu1 %v850_v2  ;;  %v856_v6 = vld [vmem:[%s1285_s1 + $0x10] ss:$8 sps:$4 sm:$0xff]   ;;  %v858_v8 = vld [vmem:[%s1285_s1 + $0x24] ss:$8 sps:$4 sm:$0xff]   ;;  %v862_v10 = vld [vmem:[%s1285_s1 + $0x20] ss:$8 sps:$4 sm:$0xff]   ;;  %v110_v46 = vunpack.c.0.s8 %v109_v40 }
   0x4   :  { %490 = vmatpush1.bf16.msra.mxu0 %v851_v3  ;;  %450 = vmatprep.subr.bf16.mxu1 %v852_v4  ;;  %v857_v7 = vld [vmem:[%s1285_s1 + $0x110] ss:$8 sps:$4 sm:$0xff]   ;;  %v860_v9 = vld [vmem:[%s1285_s1 + $0x124] ss:$8 sps:$4 sm:$0xff]   ;;  %v863_v11 = vld [vmem:[%s1285_s1 + $0x120] ss:$8 sps:$4 sm:$0xff]  }
   0x5   :  { %491 = vmatprep.subr.bf16.mxu0 %v854_v5  ;;  %v864_v12 = vld [vmem:[%s1285_s1 + $0x34] ss:$8 sps:$4 sm:$0xff]   ;;  %v868_v14 = vld [vmem:[%s1285_s1 + $0x30] ss:$8 sps:$4 sm:$0xff]   ;;  %v870_v16 = vld [vmem:[%s1285_s1 + $0x44] ss:$8 sps:$4 sm:$0xff]  }
   0x6   :  { %v866_v13 = vld [vmem:[%s1285_s1 + $0x134] ss:$8 sps:$4 sm:$0xff]   ;;  %v869_v15 = vld [vmem:[%s1285_s1 + $0x130] ss:$8 sps:$4 sm:$0xff]   ;;  %v872_v17 = vld [vmem:[%s1285_s1 + $0x144] ss:$8 sps:$4 sm:$0xff]  }
   0x7   :  { %451 = vmatpush1.bf16.msra.mxu1 %v856_v6  ;;  %v874_v18 = vld [vmem:[%s1285_s1 + $0x40] ss:$8 sps:$4 sm:$0xff]   ;;  %v876_v20 = vld [vmem:[%s1285_s1 + $0x54] ss:$8 sps:$4 sm:$0xff]   ;;  %v880_v22 = vld [vmem:[%s1285_s1 + $0x50] ss:$8 sps:$4 sm:$0xff]  }
   0x8   :  { %492 = vmatpush1.bf16.msra.mxu0 %v857_v7  ;;  %452 = vmatprep.subr.bf16.mxu1 %v858_v8  ;;  %v875_v19 = vld [vmem:[%s1285_s1 + $0x140] ss:$8 sps:$4 sm:$0xff]   ;;  %v878_v21 = vld [vmem:[%s1285_s1 + $0x154] ss:$8 sps:$4 sm:$0xff]   ;;  %v881_v23 = vld [vmem:[%s1285_s1 + $0x150] ss:$8 sps:$4 sm:$0xff]  }
   0x9   :  { %493 = vmatprep.subr.bf16.mxu0 %v860_v9  ;;  %v882_v24 = vld [vmem:[%s1285_s1 + $0x64] ss:$8 sps:$4 sm:$0xff]   ;;  %v886_v26 = vld [vmem:[%s1285_s1 + $0x60] ss:$8 sps:$4 sm:$0xff]   ;;  %v888_v28 = vld [vmem:[%s1285_s1 + $0x74] ss:$8 sps:$4 sm:$0xff]  }
   0xa   :  { %v884_v25 = vld [vmem:[%s1285_s1 + $0x164] ss:$8 sps:$4 sm:$0xff]   ;;  %v887_v27 = vld [vmem:[%s1285_s1 + $0x160] ss:$8 sps:$4 sm:$0xff]   ;;  %v890_v29 = vld [vmem:[%s1285_s1 + $0x174] ss:$8 sps:$4 sm:$0xff]  }
   0xb   :  { %453 = vmatpush1.bf16.msra.mxu1 %v862_v10  ;;  %v892_v30 = vld [vmem:[%s1285_s1 + $0x70] ss:$8 sps:$4 sm:$0xff]   ;;  %v894_v32 = vld [vmem:[%s1285_s1 + $0x84] ss:$8 sps:$4 sm:$0xff]   ;;  %v898_v34 = vld [vmem:[%s1285_s1 + $0x80] ss:$8 sps:$4 sm:$0xff]  }
   0xc   :  { %494 = vmatpush1.bf16.msra.mxu0 %v863_v11  ;;  %454 = vmatprep.subr.bf16.mxu1 %v864_v12  ;;  %v893_v31 = vld [vmem:[%s1285_s1 + $0x170] ss:$8 sps:$4 sm:$0xff]   ;;  %v896_v33 = vld [vmem:[%s1285_s1 + $0x184] ss:$8 sps:$4 sm:$0xff]   ;;  %v899_v35 = vld [vmem:[%s1285_s1 + $0x180] ss:$8 sps:$4 sm:$0xff]  }
   0xd   :  { %495 = vmatprep.subr.bf16.mxu0 %v866_v13  ;;  %v900_v36 = vld [vmem:[%s1285_s1 + $0x94] ss:$8 sps:$4 sm:$0xff]   ;;  %v904_v41 = vld [vmem:[%s1285_s1 + $0x90] ss:$8 sps:$4 sm:$0xff]   ;;  %v906_v43 = vld [vmem:[%s1285_s1 + $0xa4] ss:$8 sps:$4 sm:$0xff]  }
   0xe   :  { %v902_v37 = vld [vmem:[%s1285_s1 + $0x194] ss:$8 sps:$4 sm:$0xff]   ;;  %v905_v42 = vld [vmem:[%s1285_s1 + $0x190] ss:$8 sps:$4 sm:$0xff]   ;;  %v908_v44 = vld [vmem:[%s1285_s1 + $0x1a4] ss:$8 sps:$4 sm:$0xff]  }
   0xf   :  { %455 = vmatpush1.bf16.msra.mxu1 %v868_v14  ;;  %v1144_v45 = vshrl.u32 %v89_v38, 7  ;;  %v910_v47 = vld [vmem:[%s1285_s1 + $0xa0] ss:$8 sps:$4 sm:$0xff]   ;;  %v912_v49 = vld [vmem:[%s1285_s1 + $0xb4] ss:$8 sps:$4 sm:$0xff]  }
  0x10   :  { %496 = vmatpush1.bf16.msra.mxu0 %v869_v15  ;;  %456 = vmatprep.subr.bf16.mxu1 %v870_v16  ;;  %v911_v48 = vld [vmem:[%s1285_s1 + $0x1a0] ss:$8 sps:$4 sm:$0xff]   ;;  %v914_v50 = vld [vmem:[%s1285_s1 + $0x1b4] ss:$8 sps:$4 sm:$0xff]   ;;  %v916_v51 = vld [vmem:[%s1285_s1 + $0xb0] ss:$8 sps:$4 sm:$0xff]  }
  0x11   :  { %497 = vmatprep.subr.bf16.mxu0 %v872_v17  ;;  %v917_v52 = vld [vmem:[%s1285_s1 + $0x1b0] ss:$8 sps:$4 sm:$0xff]   ;;  %v113_v53 = vsub.s32 %v110_v46, %v1144_v45  ;;  %v736_v54 = vld.sshfl [vmem:[%s1284_s0] sm:$0x33 pattern:$0x75316420] }
  0x12   :  { %v918_v55 = vld [vmem:[%s1285_s1 + $0xc4] ss:$8 sps:$4 sm:$0xff]   ;;  %v107_v56 = vcombine.high %v736_v54, %v736_v54  ;;  %v922_v58 = vld [vmem:[%s1285_s1 + $0xc0] ss:$8 sps:$4 sm:$0xff]   ;;  %v924_v61 = vld [vmem:[%s1285_s1 + $0xd4] ss:$8 sps:$4 sm:$0xff]  }
  0x13   :  { %457 = vmatpush1.bf16.msra.mxu1 %v874_v18  ;;  %v920_v57 = vld [vmem:[%s1285_s1 + $0x1c4] ss:$8 sps:$4 sm:$0xff]   ;;  %v923_v60 = vld [vmem:[%s1285_s1 + $0x1c0] ss:$8 sps:$4 sm:$0xff]   ;;  %v926_v63 = vld [vmem:[%s1285_s1 + $0x1d4] ss:$8 sps:$4 sm:$0xff]  }
  0x14   :  { %498 = vmatpush1.bf16.msra.mxu0 %v875_v19  ;;  %458 = vmatprep.subr.bf16.mxu1 %v876_v20  ;;  %v121_v59 = vrot.slane %v107_v56, %v113_v53  ;;  %v928_v0 = vld [vmem:[%s1285_s1 + $0xd0] ss:$8 sps:$4 sm:$0xff]   ;;  %v930_v2 = vld [vmem:[%s1285_s1 + $0xe4] ss:$8 sps:$4 sm:$0xff]   ;;  %v934_v4 = vld [vmem:[%s1285_s1 + $0xe0] ss:$8 sps:$4 sm:$0xff]  }
  0x15   :  { %499 = vmatprep.subr.bf16.mxu0 %v878_v21  ;;  %v929_v1 = vld [vmem:[%s1285_s1 + $0x1d0] ss:$8 sps:$4 sm:$0xff]   ;;  %v932_v3 = vld [vmem:[%s1285_s1 + $0x1e4] ss:$8 sps:$4 sm:$0xff]   ;;  %v935_v5 = vld [vmem:[%s1285_s1 + $0x1e0] ss:$8 sps:$4 sm:$0xff]  }
  0x16   :  { %v123_v62 = vcombine.high %v121_v59, %v121_v59  ;;  %480 = vmatprep.mubr.bf16.mxu1 %v121_v59  ;;  %v936_v6 = vld [vmem:[%s1285_s1 + $0xf4] ss:$8 sps:$4 sm:$0xff]  }
  0x17   :  { %459 = vmatpush1.bf16.msra.mxu1 %v880_v22  ;;  %v938_v7 = vld [vmem:[%s1285_s1 + $0x1f4] ss:$8 sps:$4 sm:$0xff]  }
  0x18   :  { %500 = vmatpush1.bf16.msra.mxu0 %v881_v23  ;;  %460 = vmatprep.subr.bf16.mxu1 %v882_v24 }
  0x19   :  { %501 = vmatprep.subr.bf16.mxu0 %v884_v25  ;;  %521 = vmatprep.mubr.bf16.mxu0 %v123_v62 }
  0x1b   :  { %461 = vmatpush1.bf16.msra.mxu1 %v886_v26 }
  0x1c   :  { %502 = vmatpush1.bf16.msra.mxu0 %v887_v27  ;;  %462 = vmatprep.subr.bf16.mxu1 %v888_v28 }
  0x1d   :  { %503 = vmatprep.subr.bf16.mxu0 %v890_v29 }
  0x1f   :  { %463 = vmatpush1.bf16.msra.mxu1 %v892_v30 }
  0x20   :  { %504 = vmatpush1.bf16.msra.mxu0 %v893_v31  ;;  %464 = vmatprep.subr.bf16.mxu1 %v894_v32 }
  0x21   :  { %505 = vmatprep.subr.bf16.mxu0 %v896_v33 }
  0x23   :  { %465 = vmatpush1.bf16.msra.mxu1 %v898_v34 }
  0x24   :  { %506 = vmatpush1.bf16.msra.mxu0 %v899_v35  ;;  %466 = vmatprep.subr.bf16.mxu1 %v900_v36 }
  0x25   :  { %507 = vmatprep.subr.bf16.mxu0 %v902_v37 }
  0x27   :  { %467 = vmatpush1.bf16.msra.mxu1 %v904_v41 }
  0x28   :  { %508 = vmatpush1.bf16.msra.mxu0 %v905_v42  ;;  %468 = vmatprep.subr.bf16.mxu1 %v906_v43 }
  0x29   :  { %509 = vmatprep.subr.bf16.mxu0 %v908_v44 }
  0x2b   :  { %469 = vmatpush1.bf16.msra.mxu1 %v910_v47 }
  0x2c   :  { %510 = vmatpush1.bf16.msra.mxu0 %v911_v48  ;;  %470 = vmatprep.subr.bf16.mxu1 %v912_v49 }
  0x2d   :  { %511 = vmatprep.subr.bf16.mxu0 %v914_v50 }
  0x2f   :  { %471 = vmatpush1.bf16.msra.mxu1 %v916_v51 }
  0x30   :  { %512 = vmatpush1.bf16.msra.mxu0 %v917_v52  ;;  %472 = vmatprep.subr.bf16.mxu1 %v918_v55 }
  0x31   :  { %513 = vmatprep.subr.bf16.mxu0 %v920_v57 }
  0x33   :  { %473 = vmatpush1.bf16.msra.mxu1 %v922_v58 }
  0x34   :  { %514 = vmatpush1.bf16.msra.mxu0 %v923_v60  ;;  %474 = vmatprep.subr.bf16.mxu1 %v924_v61 }
  0x35   :  { %515 = vmatprep.subr.bf16.mxu0 %v926_v63 }
  0x37   :  { %475 = vmatpush1.bf16.msra.mxu1 %v928_v0 }
  0x38   :  { %516 = vmatpush1.bf16.msra.mxu0 %v929_v1  ;;  %476 = vmatprep.subr.bf16.mxu1 %v930_v2 }
  0x39   :  { %517 = vmatprep.subr.bf16.mxu0 %v932_v3 }
  0x3a   :  { %10 = vsyncpa [#allocation3], 0  ;;  %v114_v8 = vrot.slane %v736_v54, %v113_v53  ;;  %v940_v9 = vld [vmem:[%s1285_s1 + $0xf0] ss:$8 sps:$4 sm:$0xff]   ;;  %v942_v11 = vld [vmem:[%s1287_s3 + $0x40] sm:$0xff]   ;;  %v91_v28 = vsub.s32 0, %v1144_v45 }
  0x3b   :  { %477 = vmatpush1.bf16.msra.mxu1 %v934_v4  ;;  %v941_v10 = vld [vmem:[%s1285_s1 + $0x1f0] ss:$8 sps:$4 sm:$0xff]   ;;  %v943_v13 = vld [vmem:[%s1287_s3] sm:$0xff]   ;;  %v944_v14 = vld [vmem:[%s1287_s3 + $0x48] sm:$0xff]   ;;  %v95_v30 = vsub.s32 1, %v1144_v45  ;;  %vm709_vm0 = vcmask 1041408  }
  0x3c   :  { %518 = vmatpush1.bf16.msra.mxu0 %v935_v5  ;;  %478 = vmatprep.subr.bf16.mxu1 %v936_v6  ;;  %v122_v12 = vcombine.high %v114_v8, %v114_v8  ;;  %v945_v15 = vld [vmem:[%s1287_s3 + $0x8] sm:$0xff]   ;;  %v946_v16 = vld [vmem:[%s1287_s3 + $0x50] sm:$0xff]   ;;  %v948_v18 = vld [vmem:[%s1287_s3 + $0x58] sm:$0xff]   ;;  %s987_s27 = smov [#allocation2]  }
  0x3d   :  { %519 = vmatprep.subr.bf16.mxu0 %v938_v7  ;;  %v947_v17 = vld [vmem:[%s1287_s3 + $0x10] sm:$0xff]   ;;  %v949_v19 = vld [vmem:[%s1287_s3 + $0x18] sm:$0xff]   ;;  %v950_v20 = vld [vmem:[%s1287_s3 + $0x60] sm:$0xff]   ;;  %s728_s28 = sshll.u32 %s987_s27, 4  ;;  %s729_s28 = int_to_ptr.vmem [resolvable:$true] %s728_s28 }
  0x3e   :  { %v951_v21 = vld [vmem:[%s1287_s3 + $0x20] sm:$0xff]   ;;  %v952_v22 = vld [vmem:[%s1287_s3 + $0x68] sm:$0xff]   ;;  %v954_v24 = vld [vmem:[%s1287_s3 + $0x70] sm:$0xff]   ;;  %p967_p1 = scmp.lt.s32.totalorder %s729_s28, %s729_s28 }
  0x3f   :  { %479 = vmatpush1.bf16.msra.mxu1 %v940_v9  ;;  %v953_v23 = vld [vmem:[%s1287_s3 + $0x28] sm:$0xff]   ;;  %v955_v25 = vld [vmem:[%s1287_s3 + $0x30] sm:$0xff]   ;;  %v956_v26 = vld [vmem:[%s1287_s3 + $0x78] sm:$0xff]  }
  0x40   :  { %520 = vmatpush1.bf16.msra.mxu0 %v941_v10  ;;  %818 = vmatprep.subr.bf16.mxu1 %v942_v11  ;;  %v957_v27 = vld [vmem:[%s1287_s3 + $0x38] sm:$0xff]   ;;  %v87_v29 = vld [vmem:[%s1286_s2] sm:$0x3] }
  0x41   :  { %v92_v31 = vrot.slane %v87_v29, %v91_v28  ;;  %v96_v32 = vrot.slane %v87_v29, %v95_v30  ;;  %v801_v51 = vld [vmem:[%s1288_s4] ss:$0 sm:$0xff]  ;;  %s962_s4 = scalar_lea.vmem %s729_s28, 32 }
  0x42   :  { %481 = vmatmul.mubr.bf16.vlgmr.msra.gmra.mrb[0].mxu1 %v114_v8  ;;  %p963_p0 = scmp.ne.s32.totalorder %s729_s28, %s962_s4  ;;  %p968_p2 = scmp.lt.s32.totalorder %s962_s4, %s962_s4 }
  0x43   :  { %522 = vmatmul.mubr.bf16.vlgmr.msra.gmra.mrb[0].mxu0 %v122_v12  ;;  %819 = vmatpush3.bf16.msra.mxu1 %v943_v13 }
  0x44   :  { %820 = vmatprep.subr.bf16.mxu1 %v944_v14  ;;  %p969_p3 = por %p968_p2, %p967_p1 }
  0x46   :  { %p970_p4 = pnand %p969_p3, %p963_p0 }
  0x47   :  { %821 = vmatpush3.bf16.msra.mxu1 %v945_v15 }
  0x48   :  { %822 = vmatprep.subr.bf16.mxu1 %v946_v16 }
  0x4b   :  { %823 = vmatpush3.bf16.msra.mxu1 %v947_v17 }
  0x4c   :  { %824 = vmatprep.subr.bf16.mxu1 %v948_v18 }
  0x4f   :  { %825 = vmatpush3.bf16.msra.mxu1 %v949_v19 }
  0x50   :  { %826 = vmatprep.subr.bf16.mxu1 %v950_v20 }
  0x53   :  { %827 = vmatpush3.bf16.msra.mxu1 %v951_v21 }
  0x54   :  { %828 = vmatprep.subr.bf16.mxu1 %v952_v22 }
  0x57   :  { %829 = vmatpush3.bf16.msra.mxu1 %v953_v23 }
  0x58   :  { %830 = vmatprep.subr.bf16.mxu1 %v954_v24 }
  0x5b   :  { %831 = vmatpush3.bf16.msra.mxu1 %v955_v25 }
  0x5c   :  { %832 = vmatprep.subr.bf16.mxu1 %v956_v26 }
  0x5f   :  { %833 = vmatpush3.bf16.msra.mxu1 %v957_v27 }
 0x115   :  { %v482_v33 = vpop.f32.mrb[0].mxu1 }
 0x116   :  { %v523_v34 = vpop.f32.mrb[0].mxu0  ;;  %v483_v35 = vadd.f32 %v482_v33, %v92_v31  ;;  %v484_v36 = vpop.f32.mrb[1].mxu1 }
 0x117   :  { %v525_v37 = vpop.f32.mrb[1].mxu0  ;;  %v485_v38 = vadd.f32 %v484_v36, %v96_v32  ;;  %v486_v39 = vpop.f32.mrb[2].mxu1 }
 0x118   :  { %v527_v40 = vpop.f32.mrb[2].mxu0  ;;  %v524_v41 = vadd.f32 %v523_v34, %v483_v35  ;;  %v487_v42 = vpop.f32.mrb[3].mxu1 }
 0x119   :  { %v528_v43 = vpop.f32.mrb[3].mxu0  ;;  %v526_v44 = vadd.f32 %v525_v37, %v485_v38 }
 0x11a   :  { %v530_v46 = vmax.f32 %v524_v41, 0.0 }
 0x11b   :  { %v531_v47 = vmax.f32 %v526_v44, 0.0 }
 0x11c   :  { %v532_v49 = vpack.c.bf16 %v530_v46, %v530_v46 }
 0x11d   :  { %v533_v48 = vpack.c.bf16 %v531_v47, %v531_v47 }
 0x11f   :  { %701 = vmatprep.mubr.bf16.mxu1 %v533_v48 }
 0x120   :  { %702 = vmatmul.mubr.bf16.vlgmr.msra.gmra.mrb[4].mxu1 %v532_v49 }
 0x1f3   :  { %v834_v45 = vpop.f32.mrb[4].mxu1 }
 0x1f4   :  { %v835_v50 = vpop.f32.mrb[5].mxu1 }
 0x1f5   :  { %v836_v52 = vadd.f32 %v835_v50, %v834_v45  ;;  %v837_v53 = vpop.f32.mrb[6].mxu1 }
 0x1f6   :  { %v838_v54 = vpop.f32.mrb[7].mxu1 }
 0x1f7   :  { %v704_v55 = vadd.f32 %v836_v52, %v801_v51 }
 0x1f9   :  { %v710_v56 = vsel %vm709_vm0, %v704_v55, -inf }
 0x1fa   :  { %711 = vmax.xlane.f32.xlu0 %v710_v56 }
 0x287   :  { %v712_v57 = vpop.xlane.xlu0 %711 }
 0x288   :  { %v713_v58 = vsub.f32 %v704_v55, %v712_v57 }
 0x28a   :  { %v714_v59 = vmul.f32 1.442695, %v713_v58 }
 0x28c   :  { %958 = vpow2.f32 %v714_v59 }
 0x296   :  { %v959_v60 = vpop.eup %958 }
 0x297   :  { %v716_v61 = vsel %vm709_vm0, %v959_v60, 0.0 }
 0x298   :  { %717 = vadd.xlane.f32.xlu0 %v716_v61 }
 0x325   :  { %v718_v62 = vpop.xlane.xlu0 %717 }
 0x326   :  { %960 = vrcp.f32 %v718_v62 }
 0x330   :  { %v961_v63 = vpop.eup %960 }
 0x331   :  { %v720_v0 = vmul.f32 %v961_v63, %v959_v60 }
 0x333   :  { %721 = vst [vmem:[#allocation2] sm:$0x3] %v720_v0 }
 0x334   :  { %973 = shalt.err (!%p970_p4)
}
 0x335   :  { %s974_s6 = scalar_lea.hbm %s1289_s5, 32 }
 0x336   :  { %p975_p5 = scmp.ne.s32.totalorder %s1289_s5, %s974_s6  ;;  %p978_p6 = scmp.lt.u32.totalorder %s974_s6, %s1289_s5 }
 0x338   :  { %p980_p7 = pnand %p978_p6, %p975_p5 }
 0x33a   :  { %983 = shalt.err (!%p980_p7)
}
 0x33b   :  { %731 = dma.vmem_to_hbm [thread:$0]  %s729_s28, 32, %s1289_s5, [#allocation3]  }
 0x33c   :  { %984 = dma.done.wait [#allocation3], 32  }
 0x33d   :  { %985 = vsyncadd [#allocation3], 4294967264 }
 0x33e   :  { %735 = vsyncpa [#allocation3], 1 }

</bundles_post_ra>
